<compile_context>
chip_gen: v5e
topology: v5e:2x2
jax: 0.10.0
libtpu: 0.0.40
codegen_flags: <defaults>
</compile_context>

<pallas_src>
import functools
import math

import jax
import jax.numpy as jnp
import numpy as np
from jax import lax
from jax.experimental import pallas as pl
from jax.experimental.pallas import tpu as pltpu


# ------------------------------ fused kernel --------------------------------

def _encoder_kernel(x_ref, mask_ref, pos_ref, embw_ref, vec_ref,
                    wqkv_ref, wo_ref, w1_ref, w2_ref,
                    o_ref, attn_ref, *, heads, embed_size, eps, neg_bias):
    l = pl.program_id(1)                       # layer index (inner grid axis)
    E = embed_size
    Dh = E // heads
    Nb, L, F = x_ref.shape
    NL = Nb * L
    FF = w1_ref.shape[2]

    vecs = vec_ref[l]                          # (8, W) packed per-layer vectors

    # ---- layer 0 only: embedding projection + positional encoding into the
    #      resident output block (used as the carried activation).
    @pl.when(l == 0)
    def _():
        xin = x_ref[...].reshape(NL, F)
        emb = jnp.dot(xin, embw_ref[...],
                      preferred_element_type=jnp.float32)          # (NL, E)
        emb = emb + vecs[7:8, :E]                                   # emb bias
        o_ref[...] = emb.reshape(Nb, L, E) + pos_ref[...]

    x = o_ref[...]                             # (Nb, L, E) carried activation
    x2d = x.reshape(NL, E)

    # Fused block-diagonal (scaled-Q | K | V) projection: one row-batched GEMM.
    qkv = jnp.dot(x2d, wqkv_ref[l], preferred_element_type=jnp.float32)
    qkv3 = qkv.reshape(Nb, L, 3 * E)

    # Attention: static unroll over batch tile and heads; head results are
    # written as static lane-slice stores into a VMEM scratch (no concat).
    for b in range(Nb):
        mb = mask_ref[b].astype(jnp.float32) * jnp.float32(neg_bias)  # (L, L)
        for h in range(heads):
            qh = qkv3[b, :, h * Dh:(h + 1) * Dh]                      # (L, Dh)
            kh = qkv3[b, :, E + h * Dh:E + (h + 1) * Dh]              # (L, Dh)
            vh = qkv3[b, :, 2 * E + h * Dh:2 * E + (h + 1) * Dh]      # (L, Dh)
            # q . k^T (already scaled by 1/sqrt(E) via the Q weight block)
            s = lax.dot_general(qh, kh, (((1,), (1,)), ((), ())),
                                preferred_element_type=jnp.float32) + mb
            s = s - jnp.max(s, axis=-1, keepdims=True)
            p = jnp.exp(s)
            denom = jnp.sum(p, axis=-1, keepdims=True)                # (L, 1)
            oh = jnp.dot(p, vh, preferred_element_type=jnp.float32)   # (L, Dh)
            # normalize after PV matmul (EUP reciprocal, free slot)
            attn_ref[b, :, h * Dh:(h + 1) * Dh] = (
                oh * pl.reciprocal(denom, approx=True))

    bo  = vecs[0:1, :E]
    g1  = vecs[1:2, :E]
    b1  = vecs[2:3, :E]
    g2  = vecs[3:4, :E]
    b2  = vecs[4:5, :E]
    bf2 = vecs[5:6, :E]
    bf1 = vecs[6:7, :FF]

    # fc_out (row-batched)
    attn = jnp.dot(attn_ref[...].reshape(NL, E), wo_ref[l],
                   preferred_element_type=jnp.float32) + bo

    def layernorm(z, g, b):
        mu = jnp.mean(z, axis=-1, keepdims=True)
        var = jnp.mean(jnp.square(z - mu), axis=-1, keepdims=True)
        return (z - mu) * lax.rsqrt(var + jnp.float32(eps)) * g + b

    # dropout == identity (eval mode)
    x1 = layernorm(attn + x2d, g1, b1)
    h1 = jnp.maximum(
        jnp.dot(x1, w1_ref[l], preferred_element_type=jnp.float32) + bf1, 0.0)
    h2 = jnp.dot(h1, w2_ref[l], preferred_element_type=jnp.float32) + bf2
    out = layernorm(h2 + x1, g2, b2)

    o_ref[...] = out.reshape(Nb, L, E)         # carry to next layer


# --------------------------- model (params + glue) ---------------------------

def get_position_encoding(seq_len, d, n=10000):
    P = np.zeros((seq_len, d))
    for kk in range(seq_len):
        for i in np.arange(int(d / 2)):
            denominator = np.power(n, 2 * i / d)
            P[kk, 2 * i] = np.sin(kk / denominator)
            P[kk, 2 * i + 1] = np.cos(kk / denominator)
    return P


def init_params(key, embed_size, num_layers, heads, forward_expansion, max_length):
    head_dim = embed_size // heads

    def norm(k, shape, scale=0.05):
        return jax.random.normal(k, shape, jnp.float32) * scale

    keys = jax.random.split(key, 1 + num_layers)
    params = {
        "emb_w": norm(keys[0], (max_length, embed_size)),
        "emb_b": jnp.zeros((embed_size,), jnp.float32),
        "layers": [],
    }
    for li in range(num_layers):
        ks = jax.random.split(keys[1 + li], 6)
        params["layers"].append({
            "wv": norm(ks[0], (head_dim, head_dim)),
            "wk": norm(ks[1], (head_dim, head_dim)),
            "wq": norm(ks[2], (head_dim, head_dim)),
            "wo": norm(ks[3], (embed_size, embed_size)),
            "bo": jnp.zeros((embed_size,), jnp.float32),
            "g1": jnp.ones((embed_size,), jnp.float32),
            "b1": jnp.zeros((embed_size,), jnp.float32),
            "g2": jnp.ones((embed_size,), jnp.float32),
            "b2": jnp.zeros((embed_size,), jnp.float32),
            "w1": norm(ks[4], (embed_size, forward_expansion * embed_size)),
            "bf1": jnp.zeros((forward_expansion * embed_size,), jnp.float32),
            "w2": norm(ks[5], (forward_expansion * embed_size, embed_size)),
            "bf2": jnp.zeros((embed_size,), jnp.float32),
        })
    return params


def transformer_encoder_forward(params, x, pos_encoding, mask, inverse_mask,
                                heads, embed_size, batch_tile=None):
    del inverse_mask  # unused by the PyTorch forward as well
    N, L, F = x.shape
    E = embed_size
    layers = params["layers"]
    num_layers = len(layers)
    FF = layers[0]["w1"].shape[1]
    W = max(E, FF)
    inv_scale = 1.0 / math.sqrt(E)

    def block_diag(w):  # (Dh, Dh) shared across heads -> block-diagonal (E, E)
        eye = jnp.eye(heads, dtype=w.dtype)
        return (eye[:, None, :, None] * w[None, :, None, :]).reshape(E, E)

    # Fused (scaled-Q | K | V) weight, stacked along a leading layer axis.
    wqkv = jnp.stack([jnp.concatenate(
        [block_diag(p["wq"]) * jnp.float32(inv_scale),
         block_diag(p["wk"]), block_diag(p["wv"])], axis=1)
        for p in layers])                                        # (nl, E, 3E)
    wo = jnp.stack([p["wo"] for p in layers])                    # (nl, E, E)
    w1 = jnp.stack([p["w1"] for p in layers])                    # (nl, E, FF)
    w2 = jnp.stack([p["w2"] for p in layers])                    # (nl, FF, E)

    # Pack the nine tiny vectors into one (nl, 8, W) tensor (one sublane tile).
    def pad_to_w(v):
        return jnp.pad(v, (0, W - v.shape[0]))

    emb_b = params["emb_b"]
    vecs = jnp.stack([jnp.stack([
        pad_to_w(p["bo"]),  pad_to_w(p["g1"]), pad_to_w(p["b1"]),
        pad_to_w(p["g2"]),  pad_to_w(p["b2"]), pad_to_w(p["bf2"]),
        pad_to_w(p["bf1"]), pad_to_w(emb_b)]) for p in layers])  # (nl, 8, W)

    mask_i = mask.astype(jnp.int32)
    pos = pos_encoding.astype(jnp.float32)                       # (L, E)

    # Batch tiling: full fold by default (best on single-TC v5e/v6e); pass
    # batch_tile = ceil(N/2) on v7x to give each TensorCore one fat step.
    Nb = N if batch_tile is None else batch_tile
    assert N % Nb == 0
    num_tiles = N // Nb

    def resident(arr):  # whole array, constant index_map -> VMEM-resident
        nd = arr.ndim
        return pl.BlockSpec(tuple(arr.shape), lambda n, l, _nd=nd: (0,) * _nd)

    per_tile = lambda shape: pl.BlockSpec((Nb,) + shape, lambda n, l: (n, 0, 0))

    kernel = functools.partial(_encoder_kernel, heads=heads, embed_size=E,
                               eps=1e-5, neg_bias=-1e20 * inv_scale)

    return pl.pallas_call(
        kernel,
        out_shape=jax.ShapeDtypeStruct((N, L, E), jnp.float32),
        grid_spec=pltpu.PrefetchScalarGridSpec(
            num_scalar_prefetch=0,
            grid=(num_tiles, num_layers),
            in_specs=[
                per_tile((L, F)),        # x (per batch tile)
                per_tile((L, L)),        # int mask (per batch tile)
                resident(pos),           # positional encoding
                resident(params["emb_w"]),
                resident(vecs),          # packed per-layer vectors
                resident(wqkv),          # fused block-diagonal QKV weights
                resident(wo),            # fc_out weights
                resident(w1),            # ffn w1
                resident(w2),            # ffn w2
            ],
            out_specs=per_tile((L, E)),  # resident across layer axis -> carry
            scratch_shapes=[pltpu.VMEM((Nb, L, E), jnp.float32)],
        ),
        compiler_params=pltpu.CompilerParams(
            dimension_semantics=("parallel", "arbitrary")),
    )(x, mask_i, pos, params["emb_w"], vecs, wqkv, wo, w1, w2)


# ---------------------------- pure-JAX reference ----------------------------

def ref_forward(params, x, pos_encoding, mask, heads, embed_size):
    out = x @ params["emb_w"] + params["emb_b"] + pos_encoding
    for p in params["layers"]:
        N, L, E = out.shape
        Dh = E // heads
        xh = out.reshape(N, L, heads, Dh)
        v = xh @ p["wv"]
        k = xh @ p["wk"]
        q = xh @ p["wq"]
        energy = jnp.einsum("nqhd,nkhd->nhqk", q, k)
        energy = jnp.where(mask[:, None, :, :] == 1, jnp.float32(-1e20), energy)
        attn = jax.nn.softmax(energy / math.sqrt(embed_size), axis=3)
        o = jnp.einsum("nhql,nlhd->nqhd", attn, v).reshape(N, L, E)
        o = o @ p["wo"] + p["bo"]

        def ln(z, g, b):
            mu = z.mean(-1, keepdims=True)
            var = ((z - mu) ** 2).mean(-1, keepdims=True)
            return (z - mu) / jnp.sqrt(var + 1e-5) * g + b

        x1 = ln(o + out, p["g1"], p["b1"])
        h = jnp.maximum(x1 @ p["w1"] + p["bf1"], 0.0)
        h = h @ p["w2"] + p["bf2"]
        out = ln(h + x1, p["g2"], p["b2"])
    return out


# ----------------------------------- main -----------------------------------

if __name__ == "__main__":
    embed_size = 32
    num_layers = 2
    heads = 4
    forward_expansion = 2
    dropout = 0.0          # eval mode -> identity anyway
    max_length = 16
    N, L = 2, 8

    key = jax.random.PRNGKey(0)
    kx, kp = jax.random.split(key)

    x = jax.random.normal(kx, (N, L, max_length), jnp.float32)
    pos = jnp.asarray(get_position_encoding(L, embed_size), jnp.float32)   # (L, E)
    mask = jnp.zeros((N, L, L), jnp.int32).at[:, :, L - 1].set(1)          # mask last key
    inverse_mask = 1 - mask                                                # unused

    params = init_params(kp, embed_size, num_layers, heads,
                         forward_expansion, max_length)

    fwd = jax.jit(transformer_encoder_forward,
                  static_argnames=("heads", "embed_size", "batch_tile"))
    out = fwd(params, x, pos, mask, inverse_mask,
              heads=heads, embed_size=embed_size)
    out = jax.block_until_ready(out)

    ref = ref_forward(params, x, pos, mask, heads, embed_size)
    # tolerance loosened slightly vs f32-exact because of the EUP approx
    # reciprocal used for the softmax normalization
    np.testing.assert_allclose(np.asarray(out), np.asarray(ref),
                               rtol=2e-3, atol=2e-3)
    print("KERNEL_OK")
</pallas_src>

<mosaic_0001>
module attributes {stable_mosaic.version = 11 : i64} {
  func.func @_encoder_kernel(%arg0: i32, %arg1: i32, %arg2: memref<2x8x16xf32, #tpu.memory_space<vmem>>, %arg3: memref<2x8x8xi32, #tpu.memory_space<vmem>>, %arg4: memref<8x32xf32, #tpu.memory_space<vmem>>, %arg5: memref<16x32xf32, #tpu.memory_space<vmem>>, %arg6: memref<2x8x64xf32, #tpu.memory_space<vmem>>, %arg7: memref<2x32x96xf32, #tpu.memory_space<vmem>>, %arg8: memref<2x32x32xf32, #tpu.memory_space<vmem>>, %arg9: memref<2x32x64xf32, #tpu.memory_space<vmem>>, %arg10: memref<2x64x32xf32, #tpu.memory_space<vmem>>, %arg11: memref<2x8x32xf32, #tpu.memory_space<vmem>>, %arg12: memref<2x8x32xf32, #tpu.memory_space<vmem>>) attributes {dimension_semantics = [#tpu.dimension_semantics<parallel>, #tpu.dimension_semantics<arbitrary>], iteration_bounds = array<i64: 1, 2>, scalar_prefetch = 0 : i64, scratch_operands = 1 : i64, tpu.core_type = #tpu.core_type<tc>, window_params = [{transform_indices = @transform_0, window_bounds = array<i64: 2, 8, 16>}, {transform_indices = @transform_1, window_bounds = array<i64: 2, 8, 8>}, {pipeline_mode = #tpu.pipeline_mode<synchronous>, transform_indices = @transform_2, window_bounds = array<i64: 8, 32>}, {pipeline_mode = #tpu.pipeline_mode<synchronous>, transform_indices = @transform_3, window_bounds = array<i64: 16, 32>}, {pipeline_mode = #tpu.pipeline_mode<synchronous>, transform_indices = @transform_4, window_bounds = array<i64: 2, 8, 64>}, {pipeline_mode = #tpu.pipeline_mode<synchronous>, transform_indices = @transform_5, window_bounds = array<i64: 2, 32, 96>}, {pipeline_mode = #tpu.pipeline_mode<synchronous>, transform_indices = @transform_6, window_bounds = array<i64: 2, 32, 32>}, {pipeline_mode = #tpu.pipeline_mode<synchronous>, transform_indices = @transform_7, window_bounds = array<i64: 2, 32, 64>}, {pipeline_mode = #tpu.pipeline_mode<synchronous>, transform_indices = @transform_8, window_bounds = array<i64: 2, 64, 32>}, {transform_indices = @transform_9, window_bounds = array<i64: 2, 8, 32>}]} {
    %0 = arith.index_cast %arg1 : i32 to index
    %c0 = arith.constant 0 : index
    %c0_0 = arith.constant 0 : index
    %1 = vector.load %arg6[%0, %c0, %c0_0] : memref<2x8x64xf32, #tpu.memory_space<vmem>>, vector<1x8x64xf32>
    %2 = vector.shape_cast %1 : vector<1x8x64xf32> to vector<8x64xf32>
    %c0_i32 = arith.constant 0 : i32
    %3 = arith.cmpi eq, %arg1, %c0_i32 : i32
    %4 = arith.extui %3 : i1 to i32
    %c0_i32_1 = arith.constant 0 : i32
    %5 = arith.cmpi ne, %4, %c0_i32_1 : i32
    scf.if %5 {
      %c0_93 = arith.constant 0 : index
      %c0_94 = arith.constant 0 : index
      %c0_95 = arith.constant 0 : index
      %276 = vector.load %arg2[%c0_93, %c0_94, %c0_95] : memref<2x8x16xf32, #tpu.memory_space<vmem>>, vector<2x8x16xf32>
      %277 = vector.shape_cast %276 : vector<2x8x16xf32> to vector<16x16xf32>
      %c0_96 = arith.constant 0 : index
      %c0_97 = arith.constant 0 : index
      %278 = vector.load %arg5[%c0_96, %c0_97] : memref<16x32xf32, #tpu.memory_space<vmem>>, vector<16x32xf32>
      %cst_98 = arith.constant dense<0.000000e+00> : vector<16x32xf32>
      %279 = tpu.matmul %277, %278, %cst_98 {dimension_numbers = #tpu.dot_dimension_numbers<[1], [0], [0], [1], [0, 0, 1, 1], [], []>} : vector<16x16xf32>, vector<16x32xf32>, vector<16x32xf32> -> vector<16x32xf32>
      %280 = vector.extract_strided_slice %2 {offsets = [7, 0], sizes = [1, 32], strides = [1, 1]} : vector<8x64xf32> to vector<1x32xf32>
      %281 = vector.broadcast %280 : vector<1x32xf32> to vector<16x32xf32>
      %282 = arith.addf %279, %281 : vector<16x32xf32>
      %283 = vector.shape_cast %282 : vector<16x32xf32> to vector<2x8x32xf32>
      %c0_99 = arith.constant 0 : index
      %c0_100 = arith.constant 0 : index
      %284 = vector.load %arg4[%c0_99, %c0_100] : memref<8x32xf32, #tpu.memory_space<vmem>>, vector<8x32xf32>
      %285 = vector.shape_cast %284 : vector<8x32xf32> to vector<1x8x32xf32>
      %286 = vector.broadcast %285 : vector<1x8x32xf32> to vector<2x8x32xf32>
      %287 = arith.addf %283, %286 : vector<2x8x32xf32>
      %c0_101 = arith.constant 0 : index
      %c0_102 = arith.constant 0 : index
      %c0_103 = arith.constant 0 : index
      %288 = vector.load %arg11[%c0_101, %c0_102, %c0_103] : memref<2x8x32xf32, #tpu.memory_space<vmem>>, vector<2x8x32xf32>
      tpu.vector_store %arg11[%c0_101, %c0_102, %c0_103], %287 {strides = array<i32>} : memref<2x8x32xf32, #tpu.memory_space<vmem>>, vector<2x8x32xf32>,
    } else {
    }
    %c0_2 = arith.constant 0 : index
    %c0_3 = arith.constant 0 : index
    %c0_4 = arith.constant 0 : index
    %6 = vector.load %arg11[%c0_2, %c0_3, %c0_4] : memref<2x8x32xf32, #tpu.memory_space<vmem>>, vector<2x8x32xf32>
    %7 = vector.shape_cast %6 : vector<2x8x32xf32> to vector<16x32xf32>
    %8 = arith.index_cast %arg1 : i32 to index
    %c0_5 = arith.constant 0 : index
    %c0_6 = arith.constant 0 : index
    %9 = vector.load %arg7[%8, %c0_5, %c0_6] : memref<2x32x96xf32, #tpu.memory_space<vmem>>, vector<1x32x96xf32>
    %10 = vector.shape_cast %9 : vector<1x32x96xf32> to vector<32x96xf32>
    %cst = arith.constant dense<0.000000e+00> : vector<16x96xf32>
    %11 = tpu.matmul %7, %10, %cst {dimension_numbers = #tpu.dot_dimension_numbers<[1], [0], [0], [1], [0, 0, 1, 1], [], []>} : vector<16x32xf32>, vector<32x96xf32>, vector<16x96xf32> -> vector<16x96xf32>
    %12 = vector.shape_cast %11 : vector<16x96xf32> to vector<2x8x96xf32>
    %c0_7 = arith.constant 0 : index
    %c0_8 = arith.constant 0 : index
    %c0_9 = arith.constant 0 : index
    %13 = vector.load %arg3[%c0_7, %c0_8, %c0_9] : memref<2x8x8xi32, #tpu.memory_space<vmem>>, vector<1x8x8xi32>
    %14 = vector.shape_cast %13 : vector<1x8x8xi32> to vector<8x8xi32>
    %15 = arith.sitofp %14 : vector<8x8xi32> to vector<8x8xf32>
    %cst_10 = arith.constant -1.76776698E+19 : f32
    %16 = vector.broadcast %cst_10 : f32 to vector<8x8xf32>
    %17 = arith.mulf %15, %16 : vector<8x8xf32>
    %18 = vector.extract_strided_slice %12 {offsets = [0, 0, 0], sizes = [1, 8, 8], strides = [1, 1, 1]} : vector<2x8x96xf32> to vector<1x8x8xf32>
    %19 = vector.shape_cast %18 : vector<1x8x8xf32> to vector<8x8xf32>
    %20 = vector.extract_strided_slice %12 {offsets = [0, 0, 32], sizes = [1, 8, 8], strides = [1, 1, 1]} : vector<2x8x96xf32> to vector<1x8x8xf32>
    %21 = vector.shape_cast %20 : vector<1x8x8xf32> to vector<8x8xf32>
    %22 = vector.extract_strided_slice %12 {offsets = [0, 0, 64], sizes = [1, 8, 8], strides = [1, 1, 1]} : vector<2x8x96xf32> to vector<1x8x8xf32>
    %23 = vector.shape_cast %22 : vector<1x8x8xf32> to vector<8x8xf32>
    %cst_11 = arith.constant dense<0.000000e+00> : vector<8x8xf32>
    %24 = tpu.matmul %19, %21, %cst_11 {dimension_numbers = #tpu.dot_dimension_numbers<[1], [1], [0], [0], [0, 0, 1, 0], [], []>} : vector<8x8xf32>, vector<8x8xf32>, vector<8x8xf32> -> vector<8x8xf32>
    %25 = arith.addf %24, %17 : vector<8x8xf32>
    %cst_12 = arith.constant dense<0xFF800000> : vector<8xf32>
    %26 = vector.multi_reduction <maximumf>, %25, %cst_12 [1] : vector<8x8xf32> to vector<8xf32>
    %27 = vector.shape_cast %26 : vector<8xf32> to vector<8x1xf32>
    %28 = vector.broadcast %27 : vector<8x1xf32> to vector<8x8xf32>
    %29 = arith.subf %25, %28 : vector<8x8xf32>
    %30 = math.exp %29 : vector<8x8xf32>
    %cst_13 = arith.constant dense<0.000000e+00> : vector<8xf32>
    %31 = vector.multi_reduction <add>, %30, %cst_13 [1] : vector<8x8xf32> to vector<8xf32>
    %32 = vector.shape_cast %31 : vector<8xf32> to vector<8x1xf32>
    %cst_14 = arith.constant dense<0.000000e+00> : vector<8x8xf32>
    %33 = tpu.matmul %30, %23, %cst_14 {dimension_numbers = #tpu.dot_dimension_numbers<[1], [0], [0], [1], [0, 0, 1, 1], [], []>} : vector<8x8xf32>, vector<8x8xf32>, vector<8x8xf32> -> vector<8x8xf32>
    %34 = tpu.reciprocal %32 {approx = true} : vector<8x1xf32> -> vector<8x1xf32>
    %35 = vector.broadcast %34 : vector<8x1xf32> to vector<8x8xf32>
    %36 = arith.mulf %33, %35 : vector<8x8xf32>
    %c0_15 = arith.constant 0 : index
    %c0_16 = arith.constant 0 : index
    %c0_17 = arith.constant 0 : index
    %37 = vector.load %arg12[%c0_15, %c0_16, %c0_17] : memref<2x8x32xf32, #tpu.memory_space<vmem>>, vector<1x8x8xf32>
    %38 = vector.shape_cast %37 : vector<1x8x8xf32> to vector<8x8xf32>
    %39 = vector.shape_cast %36 : vector<8x8xf32> to vector<1x8x8xf32>
    tpu.vector_store %arg12[%c0_15, %c0_16, %c0_17], %39 {strides = array<i32>} : memref<2x8x32xf32, #tpu.memory_space<vmem>>, vector<1x8x8xf32>,
    %40 = vector.extract_strided_slice %12 {offsets = [0, 0, 8], sizes = [1, 8, 8], strides = [1, 1, 1]} : vector<2x8x96xf32> to vector<1x8x8xf32>
    %41 = vector.shape_cast %40 : vector<1x8x8xf32> to vector<8x8xf32>
    %42 = vector.extract_strided_slice %12 {offsets = [0, 0, 40], sizes = [1, 8, 8], strides = [1, 1, 1]} : vector<2x8x96xf32> to vector<1x8x8xf32>
    %43 = vector.shape_cast %42 : vector<1x8x8xf32> to vector<8x8xf32>
    %44 = vector.extract_strided_slice %12 {offsets = [0, 0, 72], sizes = [1, 8, 8], strides = [1, 1, 1]} : vector<2x8x96xf32> to vector<1x8x8xf32>
    %45 = vector.shape_cast %44 : vector<1x8x8xf32> to vector<8x8xf32>
    %cst_18 = arith.constant dense<0.000000e+00> : vector<8x8xf32>
    %46 = tpu.matmul %41, %43, %cst_18 {dimension_numbers = #tpu.dot_dimension_numbers<[1], [1], [0], [0], [0, 0, 1, 0], [], []>} : vector<8x8xf32>, vector<8x8xf32>, vector<8x8xf32> -> vector<8x8xf32>
    %47 = arith.addf %46, %17 : vector<8x8xf32>
    %cst_19 = arith.constant dense<0xFF800000> : vector<8xf32>
    %48 = vector.multi_reduction <maximumf>, %47, %cst_19 [1] : vector<8x8xf32> to vector<8xf32>
    %49 = vector.shape_cast %48 : vector<8xf32> to vector<8x1xf32>
    %50 = vector.broadcast %49 : vector<8x1xf32> to vector<8x8xf32>
    %51 = arith.subf %47, %50 : vector<8x8xf32>
    %52 = math.exp %51 : vector<8x8xf32>
    %cst_20 = arith.constant dense<0.000000e+00> : vector<8xf32>
    %53 = vector.multi_reduction <add>, %52, %cst_20 [1] : vector<8x8xf32> to vector<8xf32>
    %54 = vector.shape_cast %53 : vector<8xf32> to vector<8x1xf32>
    %cst_21 = arith.constant dense<0.000000e+00> : vector<8x8xf32>
    %55 = tpu.matmul %52, %45, %cst_21 {dimension_numbers = #tpu.dot_dimension_numbers<[1], [0], [0], [1], [0, 0, 1, 1], [], []>} : vector<8x8xf32>, vector<8x8xf32>, vector<8x8xf32> -> vector<8x8xf32>
    %56 = tpu.reciprocal %54 {approx = true} : vector<8x1xf32> -> vector<8x1xf32>
    %57 = vector.broadcast %56 : vector<8x1xf32> to vector<8x8xf32>
    %58 = arith.mulf %55, %57 : vector<8x8xf32>
    %c0_22 = arith.constant 0 : index
    %c0_23 = arith.constant 0 : index
    %c8 = arith.constant 8 : index
    %59 = vector.load %arg12[%c0_22, %c0_23, %c8] : memref<2x8x32xf32, #tpu.memory_space<vmem>>, vector<1x8x8xf32>
    %60 = vector.shape_cast %59 : vector<1x8x8xf32> to vector<8x8xf32>
    %61 = vector.shape_cast %58 : vector<8x8xf32> to vector<1x8x8xf32>
    tpu.vector_store %arg12[%c0_22, %c0_23, %c8], %61 {strides = array<i32>} : memref<2x8x32xf32, #tpu.memory_space<vmem>>, vector<1x8x8xf32>,
    %62 = vector.extract_strided_slice %12 {offsets = [0, 0, 16], sizes = [1, 8, 8], strides = [1, 1, 1]} : vector<2x8x96xf32> to vector<1x8x8xf32>
    %63 = vector.shape_cast %62 : vector<1x8x8xf32> to vector<8x8xf32>
    %64 = vector.extract_strided_slice %12 {offsets = [0, 0, 48], sizes = [1, 8, 8], strides = [1, 1, 1]} : vector<2x8x96xf32> to vector<1x8x8xf32>
    %65 = vector.shape_cast %64 : vector<1x8x8xf32> to vector<8x8xf32>
    %66 = vector.extract_strided_slice %12 {offsets = [0, 0, 80], sizes = [1, 8, 8], strides = [1, 1, 1]} : vector<2x8x96xf32> to vector<1x8x8xf32>
    %67 = vector.shape_cast %66 : vector<1x8x8xf32> to vector<8x8xf32>
    %cst_24 = arith.constant dense<0.000000e+00> : vector<8x8xf32>
    %68 = tpu.matmul %63, %65, %cst_24 {dimension_numbers = #tpu.dot_dimension_numbers<[1], [1], [0], [0], [0, 0, 1, 0], [], []>} : vector<8x8xf32>, vector<8x8xf32>, vector<8x8xf32> -> vector<8x8xf32>
    %69 = arith.addf %68, %17 : vector<8x8xf32>
    %cst_25 = arith.constant dense<0xFF800000> : vector<8xf32>
    %70 = vector.multi_reduction <maximumf>, %69, %cst_25 [1] : vector<8x8xf32> to vector<8xf32>
    %71 = vector.shape_cast %70 : vector<8xf32> to vector<8x1xf32>
    %72 = vector.broadcast %71 : vector<8x1xf32> to vector<8x8xf32>
    %73 = arith.subf %69, %72 : vector<8x8xf32>
    %74 = math.exp %73 : vector<8x8xf32>
    %cst_26 = arith.constant dense<0.000000e+00> : vector<8xf32>
    %75 = vector.multi_reduction <add>, %74, %cst_26 [1] : vector<8x8xf32> to vector<8xf32>
    %76 = vector.shape_cast %75 : vector<8xf32> to vector<8x1xf32>
    %cst_27 = arith.constant dense<0.000000e+00> : vector<8x8xf32>
    %77 = tpu.matmul %74, %67, %cst_27 {dimension_numbers = #tpu.dot_dimension_numbers<[1], [0], [0], [1], [0, 0, 1, 1], [], []>} : vector<8x8xf32>, vector<8x8xf32>, vector<8x8xf32> -> vector<8x8xf32>
    %78 = tpu.reciprocal %76 {approx = true} : vector<8x1xf32> -> vector<8x1xf32>
    %79 = vector.broadcast %78 : vector<8x1xf32> to vector<8x8xf32>
    %80 = arith.mulf %77, %79 : vector<8x8xf32>
    %c0_28 = arith.constant 0 : index
    %c0_29 = arith.constant 0 : index
    %c16 = arith.constant 16 : index
    %81 = vector.load %arg12[%c0_28, %c0_29, %c16] : memref<2x8x32xf32, #tpu.memory_space<vmem>>, vector<1x8x8xf32>
    %82 = vector.shape_cast %81 : vector<1x8x8xf32> to vector<8x8xf32>
    %83 = vector.shape_cast %80 : vector<8x8xf32> to vector<1x8x8xf32>
    tpu.vector_store %arg12[%c0_28, %c0_29, %c16], %83 {strides = array<i32>} : memref<2x8x32xf32, #tpu.memory_space<vmem>>, vector<1x8x8xf32>,
    %84 = vector.extract_strided_slice %12 {offsets = [0, 0, 24], sizes = [1, 8, 8], strides = [1, 1, 1]} : vector<2x8x96xf32> to vector<1x8x8xf32>
    %85 = vector.shape_cast %84 : vector<1x8x8xf32> to vector<8x8xf32>
    %86 = vector.extract_strided_slice %12 {offsets = [0, 0, 56], sizes = [1, 8, 8], strides = [1, 1, 1]} : vector<2x8x96xf32> to vector<1x8x8xf32>
    %87 = vector.shape_cast %86 : vector<1x8x8xf32> to vector<8x8xf32>
    %88 = vector.extract_strided_slice %12 {offsets = [0, 0, 88], sizes = [1, 8, 8], strides = [1, 1, 1]} : vector<2x8x96xf32> to vector<1x8x8xf32>
    %89 = vector.shape_cast %88 : vector<1x8x8xf32> to vector<8x8xf32>
    %cst_30 = arith.constant dense<0.000000e+00> : vector<8x8xf32>
    %90 = tpu.matmul %85, %87, %cst_30 {dimension_numbers = #tpu.dot_dimension_numbers<[1], [1], [0], [0], [0, 0, 1, 0], [], []>} : vector<8x8xf32>, vector<8x8xf32>, vector<8x8xf32> -> vector<8x8xf32>
    %91 = arith.addf %90, %17 : vector<8x8xf32>
    %cst_31 = arith.constant dense<0xFF800000> : vector<8xf32>
    %92 = vector.multi_reduction <maximumf>, %91, %cst_31 [1] : vector<8x8xf32> to vector<8xf32>
    %93 = vector.shape_cast %92 : vector<8xf32> to vector<8x1xf32>
    %94 = vector.broadcast %93 : vector<8x1xf32> to vector<8x8xf32>
    %95 = arith.subf %91, %94 : vector<8x8xf32>
    %96 = math.exp %95 : vector<8x8xf32>
    %cst_32 = arith.constant dense<0.000000e+00> : vector<8xf32>
    %97 = vector.multi_reduction <add>, %96, %cst_32 [1] : vector<8x8xf32> to vector<8xf32>
    %98 = vector.shape_cast %97 : vector<8xf32> to vector<8x1xf32>
    %cst_33 = arith.constant dense<0.000000e+00> : vector<8x8xf32>
    %99 = tpu.matmul %96, %89, %cst_33 {dimension_numbers = #tpu.dot_dimension_numbers<[1], [0], [0], [1], [0, 0, 1, 1], [], []>} : vector<8x8xf32>, vector<8x8xf32>, vector<8x8xf32> -> vector<8x8xf32>
    %100 = tpu.reciprocal %98 {approx = true} : vector<8x1xf32> -> vector<8x1xf32>
    %101 = vector.broadcast %100 : vector<8x1xf32> to vector<8x8xf32>
    %102 = arith.mulf %99, %101 : vector<8x8xf32>
    %c0_34 = arith.constant 0 : index
    %c0_35 = arith.constant 0 : index
    %c24 = arith.constant 24 : index
    %103 = vector.load %arg12[%c0_34, %c0_35, %c24] : memref<2x8x32xf32, #tpu.memory_space<vmem>>, vector<1x8x8xf32>
    %104 = vector.shape_cast %103 : vector<1x8x8xf32> to vector<8x8xf32>
    %105 = vector.shape_cast %102 : vector<8x8xf32> to vector<1x8x8xf32>
    tpu.vector_store %arg12[%c0_34, %c0_35, %c24], %105 {strides = array<i32>} : memref<2x8x32xf32, #tpu.memory_space<vmem>>, vector<1x8x8xf32>,
    %c1 = arith.constant 1 : index
    %c0_36 = arith.constant 0 : index
    %c0_37 = arith.constant 0 : index
    %106 = vector.load %arg3[%c1, %c0_36, %c0_37] : memref<2x8x8xi32, #tpu.memory_space<vmem>>, vector<1x8x8xi32>
    %107 = vector.shape_cast %106 : vector<1x8x8xi32> to vector<8x8xi32>
    %108 = arith.sitofp %107 : vector<8x8xi32> to vector<8x8xf32>
    %cst_38 = arith.constant -1.76776698E+19 : f32
    %109 = vector.broadcast %cst_38 : f32 to vector<8x8xf32>
    %110 = arith.mulf %108, %109 : vector<8x8xf32>
    %111 = vector.extract_strided_slice %12 {offsets = [1, 0, 0], sizes = [1, 8, 8], strides = [1, 1, 1]} : vector<2x8x96xf32> to vector<1x8x8xf32>
    %112 = vector.shape_cast %111 : vector<1x8x8xf32> to vector<8x8xf32>
    %113 = vector.extract_strided_slice %12 {offsets = [1, 0, 32], sizes = [1, 8, 8], strides = [1, 1, 1]} : vector<2x8x96xf32> to vector<1x8x8xf32>
    %114 = vector.shape_cast %113 : vector<1x8x8xf32> to vector<8x8xf32>
    %115 = vector.extract_strided_slice %12 {offsets = [1, 0, 64], sizes = [1, 8, 8], strides = [1, 1, 1]} : vector<2x8x96xf32> to vector<1x8x8xf32>
    %116 = vector.shape_cast %115 : vector<1x8x8xf32> to vector<8x8xf32>
    %cst_39 = arith.constant dense<0.000000e+00> : vector<8x8xf32>
    %117 = tpu.matmul %112, %114, %cst_39 {dimension_numbers = #tpu.dot_dimension_numbers<[1], [1], [0], [0], [0, 0, 1, 0], [], []>} : vector<8x8xf32>, vector<8x8xf32>, vector<8x8xf32> -> vector<8x8xf32>
    %118 = arith.addf %117, %110 : vector<8x8xf32>
    %cst_40 = arith.constant dense<0xFF800000> : vector<8xf32>
    %119 = vector.multi_reduction <maximumf>, %118, %cst_40 [1] : vector<8x8xf32> to vector<8xf32>
    %120 = vector.shape_cast %119 : vector<8xf32> to vector<8x1xf32>
    %121 = vector.broadcast %120 : vector<8x1xf32> to vector<8x8xf32>
    %122 = arith.subf %118, %121 : vector<8x8xf32>
    %123 = math.exp %122 : vector<8x8xf32>
    %cst_41 = arith.constant dense<0.000000e+00> : vector<8xf32>
    %124 = vector.multi_reduction <add>, %123, %cst_41 [1] : vector<8x8xf32> to vector<8xf32>
    %125 = vector.shape_cast %124 : vector<8xf32> to vector<8x1xf32>
    %cst_42 = arith.constant dense<0.000000e+00> : vector<8x8xf32>
    %126 = tpu.matmul %123, %116, %cst_42 {dimension_numbers = #tpu.dot_dimension_numbers<[1], [0], [0], [1], [0, 0, 1, 1], [], []>} : vector<8x8xf32>, vector<8x8xf32>, vector<8x8xf32> -> vector<8x8xf32>
    %127 = tpu.reciprocal %125 {approx = true} : vector<8x1xf32> -> vector<8x1xf32>
    %128 = vector.broadcast %127 : vector<8x1xf32> to vector<8x8xf32>
    %129 = arith.mulf %126, %128 : vector<8x8xf32>
    %c1_43 = arith.constant 1 : index
    %c0_44 = arith.constant 0 : index
    %c0_45 = arith.constant 0 : index
    %130 = vector.load %arg12[%c1_43, %c0_44, %c0_45] : memref<2x8x32xf32, #tpu.memory_space<vmem>>, vector<1x8x8xf32>
    %131 = vector.shape_cast %130 : vector<1x8x8xf32> to vector<8x8xf32>
    %132 = vector.shape_cast %129 : vector<8x8xf32> to vector<1x8x8xf32>
    tpu.vector_store %arg12[%c1_43, %c0_44, %c0_45], %132 {strides = array<i32>} : memref<2x8x32xf32, #tpu.memory_space<vmem>>, vector<1x8x8xf32>,
    %133 = vector.extract_strided_slice %12 {offsets = [1, 0, 8], sizes = [1, 8, 8], strides = [1, 1, 1]} : vector<2x8x96xf32> to vector<1x8x8xf32>
    %134 = vector.shape_cast %133 : vector<1x8x8xf32> to vector<8x8xf32>
    %135 = vector.extract_strided_slice %12 {offsets = [1, 0, 40], sizes = [1, 8, 8], strides = [1, 1, 1]} : vector<2x8x96xf32> to vector<1x8x8xf32>
    %136 = vector.shape_cast %135 : vector<1x8x8xf32> to vector<8x8xf32>
    %137 = vector.extract_strided_slice %12 {offsets = [1, 0, 72], sizes = [1, 8, 8], strides = [1, 1, 1]} : vector<2x8x96xf32> to vector<1x8x8xf32>
    %138 = vector.shape_cast %137 : vector<1x8x8xf32> to vector<8x8xf32>
    %cst_46 = arith.constant dense<0.000000e+00> : vector<8x8xf32>
    %139 = tpu.matmul %134, %136, %cst_46 {dimension_numbers = #tpu.dot_dimension_numbers<[1], [1], [0], [0], [0, 0, 1, 0], [], []>} : vector<8x8xf32>, vector<8x8xf32>, vector<8x8xf32> -> vector<8x8xf32>
    %140 = arith.addf %139, %110 : vector<8x8xf32>
    %cst_47 = arith.constant dense<0xFF800000> : vector<8xf32>
    %141 = vector.multi_reduction <maximumf>, %140, %cst_47 [1] : vector<8x8xf32> to vector<8xf32>
    %142 = vector.shape_cast %141 : vector<8xf32> to vector<8x1xf32>
    %143 = vector.broadcast %142 : vector<8x1xf32> to vector<8x8xf32>
    %144 = arith.subf %140, %143 : vector<8x8xf32>
    %145 = math.exp %144 : vector<8x8xf32>
    %cst_48 = arith.constant dense<0.000000e+00> : vector<8xf32>
    %146 = vector.multi_reduction <add>, %145, %cst_48 [1] : vector<8x8xf32> to vector<8xf32>
    %147 = vector.shape_cast %146 : vector<8xf32> to vector<8x1xf32>
    %cst_49 = arith.constant dense<0.000000e+00> : vector<8x8xf32>
    %148 = tpu.matmul %145, %138, %cst_49 {dimension_numbers = #tpu.dot_dimension_numbers<[1], [0], [0], [1], [0, 0, 1, 1], [], []>} : vector<8x8xf32>, vector<8x8xf32>, vector<8x8xf32> -> vector<8x8xf32>
    %149 = tpu.reciprocal %147 {approx = true} : vector<8x1xf32> -> vector<8x1xf32>
    %150 = vector.broadcast %149 : vector<8x1xf32> to vector<8x8xf32>
    %151 = arith.mulf %148, %150 : vector<8x8xf32>
    %c1_50 = arith.constant 1 : index
    %c0_51 = arith.constant 0 : index
    %c8_52 = arith.constant 8 : index
    %152 = vector.load %arg12[%c1_50, %c0_51, %c8_52] : memref<2x8x32xf32, #tpu.memory_space<vmem>>, vector<1x8x8xf32>
    %153 = vector.shape_cast %152 : vector<1x8x8xf32> to vector<8x8xf32>
    %154 = vector.shape_cast %151 : vector<8x8xf32> to vector<1x8x8xf32>
    tpu.vector_store %arg12[%c1_50, %c0_51, %c8_52], %154 {strides = array<i32>} : memref<2x8x32xf32, #tpu.memory_space<vmem>>, vector<1x8x8xf32>,
    %155 = vector.extract_strided_slice %12 {offsets = [1, 0, 16], sizes = [1, 8, 8], strides = [1, 1, 1]} : vector<2x8x96xf32> to vector<1x8x8xf32>
    %156 = vector.shape_cast %155 : vector<1x8x8xf32> to vector<8x8xf32>
    %157 = vector.extract_strided_slice %12 {offsets = [1, 0, 48], sizes = [1, 8, 8], strides = [1, 1, 1]} : vector<2x8x96xf32> to vector<1x8x8xf32>
    %158 = vector.shape_cast %157 : vector<1x8x8xf32> to vector<8x8xf32>
    %159 = vector.extract_strided_slice %12 {offsets = [1, 0, 80], sizes = [1, 8, 8], strides = [1, 1, 1]} : vector<2x8x96xf32> to vector<1x8x8xf32>
    %160 = vector.shape_cast %159 : vector<1x8x8xf32> to vector<8x8xf32>
    %cst_53 = arith.constant dense<0.000000e+00> : vector<8x8xf32>
    %161 = tpu.matmul %156, %158, %cst_53 {dimension_numbers = #tpu.dot_dimension_numbers<[1], [1], [0], [0], [0, 0, 1, 0], [], []>} : vector<8x8xf32>, vector<8x8xf32>, vector<8x8xf32> -> vector<8x8xf32>
    %162 = arith.addf %161, %110 : vector<8x8xf32>
    %cst_54 = arith.constant dense<0xFF800000> : vector<8xf32>
    %163 = vector.multi_reduction <maximumf>, %162, %cst_54 [1] : vector<8x8xf32> to vector<8xf32>
    %164 = vector.shape_cast %163 : vector<8xf32> to vector<8x1xf32>
    %165 = vector.broadcast %164 : vector<8x1xf32> to vector<8x8xf32>
    %166 = arith.subf %162, %165 : vector<8x8xf32>
    %167 = math.exp %166 : vector<8x8xf32>
    %cst_55 = arith.constant dense<0.000000e+00> : vector<8xf32>
    %168 = vector.multi_reduction <add>, %167, %cst_55 [1] : vector<8x8xf32> to vector<8xf32>
    %169 = vector.shape_cast %168 : vector<8xf32> to vector<8x1xf32>
    %cst_56 = arith.constant dense<0.000000e+00> : vector<8x8xf32>
    %170 = tpu.matmul %167, %160, %cst_56 {dimension_numbers = #tpu.dot_dimension_numbers<[1], [0], [0], [1], [0, 0, 1, 1], [], []>} : vector<8x8xf32>, vector<8x8xf32>, vector<8x8xf32> -> vector<8x8xf32>
    %171 = tpu.reciprocal %169 {approx = true} : vector<8x1xf32> -> vector<8x1xf32>
    %172 = vector.broadcast %171 : vector<8x1xf32> to vector<8x8xf32>
    %173 = arith.mulf %170, %172 : vector<8x8xf32>
    %c1_57 = arith.constant 1 : index
    %c0_58 = arith.constant 0 : index
    %c16_59 = arith.constant 16 : index
    %174 = vector.load %arg12[%c1_57, %c0_58, %c16_59] : memref<2x8x32xf32, #tpu.memory_space<vmem>>, vector<1x8x8xf32>
    %175 = vector.shape_cast %174 : vector<1x8x8xf32> to vector<8x8xf32>
    %176 = vector.shape_cast %173 : vector<8x8xf32> to vector<1x8x8xf32>
    tpu.vector_store %arg12[%c1_57, %c0_58, %c16_59], %176 {strides = array<i32>} : memref<2x8x32xf32, #tpu.memory_space<vmem>>, vector<1x8x8xf32>,
    %177 = vector.extract_strided_slice %12 {offsets = [1, 0, 24], sizes = [1, 8, 8], strides = [1, 1, 1]} : vector<2x8x96xf32> to vector<1x8x8xf32>
    %178 = vector.shape_cast %177 : vector<1x8x8xf32> to vector<8x8xf32>
    %179 = vector.extract_strided_slice %12 {offsets = [1, 0, 56], sizes = [1, 8, 8], strides = [1, 1, 1]} : vector<2x8x96xf32> to vector<1x8x8xf32>
    %180 = vector.shape_cast %179 : vector<1x8x8xf32> to vector<8x8xf32>
    %181 = vector.extract_strided_slice %12 {offsets = [1, 0, 88], sizes = [1, 8, 8], strides = [1, 1, 1]} : vector<2x8x96xf32> to vector<1x8x8xf32>
    %182 = vector.shape_cast %181 : vector<1x8x8xf32> to vector<8x8xf32>
    %cst_60 = arith.constant dense<0.000000e+00> : vector<8x8xf32>
    %183 = tpu.matmul %178, %180, %cst_60 {dimension_numbers = #tpu.dot_dimension_numbers<[1], [1], [0], [0], [0, 0, 1, 0], [], []>} : vector<8x8xf32>, vector<8x8xf32>, vector<8x8xf32> -> vector<8x8xf32>
    %184 = arith.addf %183, %110 : vector<8x8xf32>
    %cst_61 = arith.constant dense<0xFF800000> : vector<8xf32>
    %185 = vector.multi_reduction <maximumf>, %184, %cst_61 [1] : vector<8x8xf32> to vector<8xf32>
    %186 = vector.shape_cast %185 : vector<8xf32> to vector<8x1xf32>
    %187 = vector.broadcast %186 : vector<8x1xf32> to vector<8x8xf32>
    %188 = arith.subf %184, %187 : vector<8x8xf32>
    %189 = math.exp %188 : vector<8x8xf32>
    %cst_62 = arith.constant dense<0.000000e+00> : vector<8xf32>
    %190 = vector.multi_reduction <add>, %189, %cst_62 [1] : vector<8x8xf32> to vector<8xf32>
    %191 = vector.shape_cast %190 : vector<8xf32> to vector<8x1xf32>
    %cst_63 = arith.constant dense<0.000000e+00> : vector<8x8xf32>
    %192 = tpu.matmul %189, %182, %cst_63 {dimension_numbers = #tpu.dot_dimension_numbers<[1], [0], [0], [1], [0, 0, 1, 1], [], []>} : vector<8x8xf32>, vector<8x8xf32>, vector<8x8xf32> -> vector<8x8xf32>
    %193 = tpu.reciprocal %191 {approx = true} : vector<8x1xf32> -> vector<8x1xf32>
    %194 = vector.broadcast %193 : vector<8x1xf32> to vector<8x8xf32>
    %195 = arith.mulf %192, %194 : vector<8x8xf32>
    %c1_64 = arith.constant 1 : index
    %c0_65 = arith.constant 0 : index
    %c24_66 = arith.constant 24 : index
    %196 = vector.load %arg12[%c1_64, %c0_65, %c24_66] : memref<2x8x32xf32, #tpu.memory_space<vmem>>, vector<1x8x8xf32>
    %197 = vector.shape_cast %196 : vector<1x8x8xf32> to vector<8x8xf32>
    %198 = vector.shape_cast %195 : vector<8x8xf32> to vector<1x8x8xf32>
    tpu.vector_store %arg12[%c1_64, %c0_65, %c24_66], %198 {strides = array<i32>} : memref<2x8x32xf32, #tpu.memory_space<vmem>>, vector<1x8x8xf32>,
    %199 = vector.extract_strided_slice %2 {offsets = [0, 0], sizes = [1, 32], strides = [1, 1]} : vector<8x64xf32> to vector<1x32xf32>
    %200 = vector.extract_strided_slice %2 {offsets = [1, 0], sizes = [1, 32], strides = [1, 1]} : vector<8x64xf32> to vector<1x32xf32>
    %201 = vector.extract_strided_slice %2 {offsets = [2, 0], sizes = [1, 32], strides = [1, 1]} : vector<8x64xf32> to vector<1x32xf32>
    %202 = vector.extract_strided_slice %2 {offsets = [3, 0], sizes = [1, 32], strides = [1, 1]} : vector<8x64xf32> to vector<1x32xf32>
    %203 = vector.extract_strided_slice %2 {offsets = [4, 0], sizes = [1, 32], strides = [1, 1]} : vector<8x64xf32> to vector<1x32xf32>
    %204 = vector.extract_strided_slice %2 {offsets = [5, 0], sizes = [1, 32], strides = [1, 1]} : vector<8x64xf32> to vector<1x32xf32>
    %205 = vector.extract_strided_slice %2 {offsets = [6, 0], sizes = [1, 64], strides = [1, 1]} : vector<8x64xf32> to vector<1x64xf32>
    %c0_67 = arith.constant 0 : index
    %c0_68 = arith.constant 0 : index
    %c0_69 = arith.constant 0 : index
    %206 = vector.load %arg12[%c0_67, %c0_68, %c0_69] : memref<2x8x32xf32, #tpu.memory_space<vmem>>, vector<2x8x32xf32>
    %207 = vector.shape_cast %206 : vector<2x8x32xf32> to vector<16x32xf32>
    %208 = arith.index_cast %arg1 : i32 to index
    %c0_70 = arith.constant 0 : index
    %c0_71 = arith.constant 0 : index
    %209 = vector.load %arg8[%208, %c0_70, %c0_71] : memref<2x32x32xf32, #tpu.memory_space<vmem>>, vector<1x32x32xf32>
    %210 = vector.shape_cast %209 : vector<1x32x32xf32> to vector<32x32xf32>
    %cst_72 = arith.constant dense<0.000000e+00> : vector<16x32xf32>
    %211 = tpu.matmul %207, %210, %cst_72 {dimension_numbers = #tpu.dot_dimension_numbers<[1], [0], [0], [1], [0, 0, 1, 1], [], []>} : vector<16x32xf32>, vector<32x32xf32>, vector<16x32xf32> -> vector<16x32xf32>
    %212 = vector.broadcast %199 : vector<1x32xf32> to vector<16x32xf32>
    %213 = arith.addf %211, %212 : vector<16x32xf32>
    %214 = arith.addf %213, %7 : vector<16x32xf32>
    %cst_73 = arith.constant dense<0.000000e+00> : vector<16xf32>
    %215 = vector.multi_reduction <add>, %214, %cst_73 [1] : vector<16x32xf32> to vector<16xf32>
    %216 = vector.shape_cast %215 : vector<16xf32> to vector<16x1xf32>
    %cst_74 = arith.constant 3.200000e+01 : f32
    %217 = vector.broadcast %cst_74 : f32 to vector<16x1xf32>
    %218 = arith.divf %216, %217 : vector<16x1xf32>
    %219 = vector.broadcast %218 : vector<16x1xf32> to vector<16x32xf32>
    %220 = arith.subf %214, %219 : vector<16x32xf32>
    %221 = arith.mulf %220, %220 : vector<16x32xf32>
    %cst_75 = arith.constant dense<0.000000e+00> : vector<16xf32>
    %222 = vector.multi_reduction <add>, %221, %cst_75 [1] : vector<16x32xf32> to vector<16xf32>
    %223 = vector.shape_cast %222 : vector<16xf32> to vector<16x1xf32>
    %cst_76 = arith.constant 3.200000e+01 : f32
    %224 = vector.broadcast %cst_76 : f32 to vector<16x1xf32>
    %225 = arith.divf %223, %224 : vector<16x1xf32>
    %226 = vector.broadcast %218 : vector<16x1xf32> to vector<16x32xf32>
    %227 = arith.subf %214, %226 : vector<16x32xf32>
    %cst_77 = arith.constant 9.99999974E-6 : f32
    %228 = vector.broadcast %cst_77 : f32 to vector<16x1xf32>
    %229 = arith.addf %225, %228 : vector<16x1xf32>
    %230 = math.rsqrt %229 : vector<16x1xf32>
    %231 = vector.broadcast %230 : vector<16x1xf32> to vector<16x32xf32>
    %232 = arith.mulf %227, %231 : vector<16x32xf32>
    %233 = vector.broadcast %200 : vector<1x32xf32> to vector<16x32xf32>
    %234 = arith.mulf %232, %233 : vector<16x32xf32>
    %235 = vector.broadcast %201 : vector<1x32xf32> to vector<16x32xf32>
    %236 = arith.addf %234, %235 : vector<16x32xf32>
    %237 = arith.index_cast %arg1 : i32 to index
    %c0_78 = arith.constant 0 : index
    %c0_79 = arith.constant 0 : index
    %238 = vector.load %arg9[%237, %c0_78, %c0_79] : memref<2x32x64xf32, #tpu.memory_space<vmem>>, vector<1x32x64xf32>
    %239 = vector.shape_cast %238 : vector<1x32x64xf32> to vector<32x64xf32>
    %cst_80 = arith.constant dense<0.000000e+00> : vector<16x64xf32>
    %240 = tpu.matmul %236, %239, %cst_80 {dimension_numbers = #tpu.dot_dimension_numbers<[1], [0], [0], [1], [0, 0, 1, 1], [], []>} : vector<16x32xf32>, vector<32x64xf32>, vector<16x64xf32> -> vector<16x64xf32>
    %241 = vector.broadcast %205 : vector<1x64xf32> to vector<16x64xf32>
    %242 = arith.addf %240, %241 : vector<16x64xf32>
    %cst_81 = arith.constant 0.000000e+00 : f32
    %243 = vector.broadcast %cst_81 : f32 to vector<16x64xf32>
    %244 = arith.maximumf %242, %243 : vector<16x64xf32>
    %245 = arith.index_cast %arg1 : i32 to index
    %c0_82 = arith.constant 0 : index
    %c0_83 = arith.constant 0 : index
    %246 = vector.load %arg10[%245, %c0_82, %c0_83] : memref<2x64x32xf32, #tpu.memory_space<vmem>>, vector<1x64x32xf32>
    %247 = vector.shape_cast %246 : vector<1x64x32xf32> to vector<64x32xf32>
    %cst_84 = arith.constant dense<0.000000e+00> : vector<16x32xf32>
    %248 = tpu.matmul %244, %247, %cst_84 {dimension_numbers = #tpu.dot_dimension_numbers<[1], [0], [0], [1], [0, 0, 1, 1], [], []>} : vector<16x64xf32>, vector<64x32xf32>, vector<16x32xf32> -> vector<16x32xf32>
    %249 = vector.broadcast %204 : vector<1x32xf32> to vector<16x32xf32>
    %250 = arith.addf %248, %249 : vector<16x32xf32>
    %251 = arith.addf %250, %236 : vector<16x32xf32>
    %cst_85 = arith.constant dense<0.000000e+00> : vector<16xf32>
    %252 = vector.multi_reduction <add>, %251, %cst_85 [1] : vector<16x32xf32> to vector<16xf32>
    %253 = vector.shape_cast %252 : vector<16xf32> to vector<16x1xf32>
    %cst_86 = arith.constant 3.200000e+01 : f32
    %254 = vector.broadcast %cst_86 : f32 to vector<16x1xf32>
    %255 = arith.divf %253, %254 : vector<16x1xf32>
    %256 = vector.broadcast %255 : vector<16x1xf32> to vector<16x32xf32>
    %257 = arith.subf %251, %256 : vector<16x32xf32>
    %258 = arith.mulf %257, %257 : vector<16x32xf32>
    %cst_87 = arith.constant dense<0.000000e+00> : vector<16xf32>
    %259 = vector.multi_reduction <add>, %258, %cst_87 [1] : vector<16x32xf32> to vector<16xf32>
    %260 = vector.shape_cast %259 : vector<16xf32> to vector<16x1xf32>
    %cst_88 = arith.constant 3.200000e+01 : f32
    %261 = vector.broadcast %cst_88 : f32 to vector<16x1xf32>
    %262 = arith.divf %260, %261 : vector<16x1xf32>
    %263 = vector.broadcast %255 : vector<16x1xf32> to vector<16x32xf32>
    %264 = arith.subf %251, %263 : vector<16x32xf32>
    %cst_89 = arith.constant 9.99999974E-6 : f32
    %265 = vector.broadcast %cst_89 : f32 to vector<16x1xf32>
    %266 = arith.addf %262, %265 : vector<16x1xf32>
    %267 = math.rsqrt %266 : vector<16x1xf32>
    %268 = vector.broadcast %267 : vector<16x1xf32> to vector<16x32xf32>
    %269 = arith.mulf %264, %268 : vector<16x32xf32>
    %270 = vector.broadcast %202 : vector<1x32xf32> to vector<16x32xf32>
    %271 = arith.mulf %269, %270 : vector<16x32xf32>
    %272 = vector.broadcast %203 : vector<1x32xf32> to vector<16x32xf32>
    %273 = arith.addf %271, %272 : vector<16x32xf32>
    %274 = vector.shape_cast %273 : vector<16x32xf32> to vector<2x8x32xf32>
    %c0_90 = arith.constant 0 : index
    %c0_91 = arith.constant 0 : index
    %c0_92 = arith.constant 0 : index
    %275 = vector.load %arg11[%c0_90, %c0_91, %c0_92] : memref<2x8x32xf32, #tpu.memory_space<vmem>>, vector<2x8x32xf32>
    tpu.vector_store %arg11[%c0_90, %c0_91, %c0_92], %274 {strides = array<i32>} : memref<2x8x32xf32, #tpu.memory_space<vmem>>, vector<2x8x32xf32>,
    return
  }
  func.func @transform_0(%arg0: i32, %arg1: i32) -> (i32, i32, i32) {
    %c0_i32 = arith.constant 0 : i32
    %c0_i32_0 = arith.constant 0 : i32
    %c0_i32_1 = arith.constant 0 : i32
    return %arg0, %c0_i32, %c0_i32_0 : i32, i32, i32
  }
  func.func @transform_1(%arg0: i32, %arg1: i32) -> (i32, i32, i32) {
    %c0_i32 = arith.constant 0 : i32
    %c0_i32_0 = arith.constant 0 : i32
    %c0_i32_1 = arith.constant 0 : i32
    return %arg0, %c0_i32, %c0_i32_0 : i32, i32, i32
  }
  func.func @transform_2(%arg0: i32, %arg1: i32) -> (i32, i32) {
    %c0_i32 = arith.constant 0 : i32
    %c0_i32_0 = arith.constant 0 : i32
    %c0_i32_1 = arith.constant 0 : i32
    return %c0_i32, %c0_i32_0 : i32, i32
  }
  func.func @transform_3(%arg0: i32, %arg1: i32) -> (i32, i32) {
    %c0_i32 = arith.constant 0 : i32
    %c0_i32_0 = arith.constant 0 : i32
    %c0_i32_1 = arith.constant 0 : i32
    return %c0_i32, %c0_i32_0 : i32, i32
  }
  func.func @transform_4(%arg0: i32, %arg1: i32) -> (i32, i32, i32) {
    %c0_i32 = arith.constant 0 : i32
    %c0_i32_0 = arith.constant 0 : i32
    %c0_i32_1 = arith.constant 0 : i32
    %c0_i32_2 = arith.constant 0 : i32
    return %c0_i32, %c0_i32_0, %c0_i32_1 : i32, i32, i32
  }
  func.func @transform_5(%arg0: i32, %arg1: i32) -> (i32, i32, i32) {
    %c0_i32 = arith.constant 0 : i32
    %c0_i32_0 = arith.constant 0 : i32
    %c0_i32_1 = arith.constant 0 : i32
    %c0_i32_2 = arith.constant 0 : i32
    return %c0_i32, %c0_i32_0, %c0_i32_1 : i32, i32, i32
  }
  func.func @transform_6(%arg0: i32, %arg1: i32) -> (i32, i32, i32) {
    %c0_i32 = arith.constant 0 : i32
    %c0_i32_0 = arith.constant 0 : i32
    %c0_i32_1 = arith.constant 0 : i32
    %c0_i32_2 = arith.constant 0 : i32
    return %c0_i32, %c0_i32_0, %c0_i32_1 : i32, i32, i32
  }
  func.func @transform_7(%arg0: i32, %arg1: i32) -> (i32, i32, i32) {
    %c0_i32 = arith.constant 0 : i32
    %c0_i32_0 = arith.constant 0 : i32
    %c0_i32_1 = arith.constant 0 : i32
    %c0_i32_2 = arith.constant 0 : i32
    return %c0_i32, %c0_i32_0, %c0_i32_1 : i32, i32, i32
  }
  func.func @transform_8(%arg0: i32, %arg1: i32) -> (i32, i32, i32) {
    %c0_i32 = arith.constant 0 : i32
    %c0_i32_0 = arith.constant 0 : i32
    %c0_i32_1 = arith.constant 0 : i32
    %c0_i32_2 = arith.constant 0 : i32
    return %c0_i32, %c0_i32_0, %c0_i32_1 : i32, i32, i32
  }
  func.func @transform_9(%arg0: i32, %arg1: i32) -> (i32, i32, i32) {
    %c0_i32 = arith.constant 0 : i32
    %c0_i32_0 = arith.constant 0 : i32
    %c0_i32_1 = arith.constant 0 : i32
    return %arg0, %c0_i32, %c0_i32_0 : i32, i32, i32
  }
}

</mosaic_0001>

<bundles_post_ra>
// kernel: transformer_encoder_forward.1
= control target key start
LH: loop header
LB: loop body
LE: loop exit
PB: predicated region body
PF: predicated region fallthrough
CT: control target
= control target key end

     0   :  { %14 = vsyncpa [#allocation4], 0  ;;  %s1591_s30 = smov 0   ;;  %s1593_s10 = smov 0   ;;  %s1838_s0 = inlined_call_operand.vmem [shape: f32[2,8,16], index: 0, kind: input, shape index: {}]   ;;  %s1839_s1 = inlined_call_operand.vmem [shape: s32[2,8,8], index: 1, kind: input, shape index: {}]   ;;  %s1840_s2 = inlined_call_operand.vmem [shape: f32[8,32], index: 2, kind: input, shape index: {}]   ;;  %s1841_s3 = inlined_call_operand.vmem [shape: f32[16,32], index: 3, kind: input, shape index: {}]   ;;  %s1842_s4 = inlined_call_operand.vmem [shape: f32[2,8,64], index: 4, kind: input, shape index: {}]   ;;  %s1843_s5 = inlined_call_operand.vmem [shape: f32[2,32,96], index: 5, kind: input, shape index: {}]   ;;  %s1844_s6 = inlined_call_operand.vmem [shape: f32[2,32,32], index: 6, kind: input, shape index: {}]   ;;  %s1845_s7 = inlined_call_operand.vmem [shape: f32[2,32,64], index: 7, kind: input, shape index: {}]   ;;  %s1846_s8 = inlined_call_operand.vmem [shape: f32[2,64,32], index: 8, kind: input, shape index: {}]   ;;  %s1847_s9 = inlined_call_operand.hbm [shape: f32[2,8,32], index: 9, kind: output, shape index: {}]  }
   0x1   :  { %s1595_s11 = smov 0  }
   0x2 LB: > { %s1329_s12 = sadd.s32 4294967295, %s1522_s11   ;;  %s29_s13 = sadd.s32 1, %s1518_s10  ;;  %s1522_s11 = sphi %s1595_s11, %s20_s11   ;;  %s1518_s10 = sphi %s1593_s10, %s1849_s10   ;;  %s1514_s30 = sphi %s1591_s30, %s1848_s30  }
   0x3   : > { %p30_p0 = scmp.ge.s32.totalorder %s29_s13, 2  ;;  %p1333_p1 = scmp.ge.s32.totalorder %s1522_s11, 1 }
   0x4   : > { %p312_p2 = scmp.lt.s32.totalorder %s1522_s11, 3 }
   0x5   : > { %s1851_s13 = smov (%p30_p0, %s29_s13), 0 }
   0x6   : > { %p313_p3 = pnand %p1333_p1, %p312_p2 }
   0x7   : > { %s1334_s14 = sshll.u32 (!%p313_p3), %s1514_s30, 3  ;;  %p1335_p4 = scmp.ne.s32.totalorder (!%p313_p3), %s1514_s30, 0 }
   0x8   : > { %316 = sbr.rel (%p313_p3) target bundleno = 2409 (0x969), region = 56  ;;  %s362_s17 = scalar_lea.vmem (!%p313_p3), %s1842_s4, %s1334_s14 }
   0xd   : > { %v1616_v0 = vld [vmem:[%s362_s17] sm:$0xff]  ;;  %367 = sbr.rel (%p1335_p4) target bundleno = 154 (0x9a), region = 60 }
  0x12   : > { %v371_v1 = vld [vmem:[%s1841_s3 + $0x8] sm:$0xff]  ;;  %v370_v2 = vld [vmem:[%s1841_s3] sm:$0xff]  ;;  %vm373_vm0 = vcmask 130048   ;;  %v372_v5 = vperm.slane %v1616_v0, 7  ;;  %vm406_vm1 = vcmask 261120  }
  0x13   : > { %394 = vmatpush.msra.mxu0 %v371_v1  ;;  %1377 = vmatpush.msra.mxu1 %v371_v1  ;;  %v368_v3 = vld [vmem:[%s1838_s0] sm:$0xff]  ;;  %v369_v4 = vld [vmem:[%s1838_s0 + $0x8] sm:$0xff] }
  0x14   : > { %v403_v7 = vld [vmem:[%s1840_s2] sm:$0xff] }
  0x15   : > { %395 = vmatpush.msra.mxu0 %v370_v2  ;;  %1378 = vmatpush.msra.mxu1 %v370_v2 }
  0x16   : > { %1336 = vmatmul.msk.f32.vlgmr.msra.gmra.mxu0 %vm373_vm0, %v368_v3  ;;  %1337 = vmatmul.msk.f32.vlgmr.msra.gmra.mxu1 %vm373_vm0, %v369_v4 }
  0x93   : > { %v397_v6 = vpop.f32.mrf.mxu0  ;;  %v400_v8 = vpop.f32.mrf.mxu1 }
  0x94   : > { %v398_v9 = vadd.f32 %v397_v6, %v372_v5  ;;  %v401_v10 = vadd.f32 %v400_v8, %v372_v5 }
  0x96   : > { %v404_v11 = vadd.f32 %v403_v7, %v398_v9  ;;  %v405_v12 = vadd.f32 %v403_v7, %v401_v10 }
  0x98   : > { %407 = vst.msk [vmem:[#allocation3] sm:$0xff] %vm406_vm1, %v404_v11 }
  0x99   : > { %408 = vst.msk [vmem:[#allocation3 + $0x8] sm:$0xff] %vm406_vm1, %v405_v12 }
  0x9a PF: > { %s1636_s28 = sshll.u32 %s1514_s30, 5  ;;  %vm417_vm2 = vcmask 261120   ;;  %s1524_s16 = smov 64   ;;  %vm453_vm3 = vcmask 64512   ;;  %v447_v28 = vld [vmem:[%s1839_s1] sm:$0xff]  ;;  %v1353_v59 = vld [vmem:[%s1839_s1 + $0x8] sm:$0xff] }
  0x9b   : > { %s412_s15 = scalar_lea.vmem %s1843_s5, %s1636_s28  ;;  %s1525_s17 = smov 88   ;;  %v448_v29 = vcvt.s32.f32 %v447_v28  ;;  %v731_v61 = vcvt.s32.f32 %v1353_v59  ;;  %vm585_vm4 = vcmask 130112   ;;  %vm656_vm5 = vcmask 195712  }
  0x9c   : > { %v416_v13 = vld [vmem:[%s412_s15 + $0x18] sm:$0xff]  ;;  %v415_v14 = vld [vmem:[%s412_s15 + $0x10] sm:$0xff]  ;;  %v414_v15 = vld [vmem:[%s412_s15 + $0x8] sm:$0xff]  ;;  %s1526_s18 = smov 96   ;;  %s1527_s19 = smov 80   ;;  %vm727_vm6 = vcmask 261312  }
  0x9d   : > { %436 = vmatpush.msra.mxu0 %v416_v13  ;;  %v413_v16 = vld [vmem:[%s412_s15] sm:$0xff]  ;;  %s1528_s20 = smov 120   ;;  %s1529_s21 = smov 72   ;;  %v1679_v30 = vmul.f32 -1.767767e+19, %v448_v29  ;;  %vm1153_vm14 = vcmask 523264  }
  0x9e   : > { %s1530_s22 = smov 112   ;;  %s1531_s23 = smov 48   ;;  %v732_v62 = vmul.f32 -1.767767e+19, %v731_v61 }
  0x9f   : > { %437 = vmatpush.msra.mxu0 %v415_v14  ;;  %v1642_v17 = vld [vmem:[#allocation3] sm:$0xff]  ;;  %s1532_s26 = smov 56   ;;  %s1533_s27 = smov 104  }
  0xa0   : > { %v1646_v18 = vld [vmem:[#allocation3 + $0x8] sm:$0xff]  ;;  %s1534_s15 = smov 40   ;;  %s1105_s24 = scalar_lea.vmem %s1845_s7, %s1636_s28 }
  0xa1   : > { %438 = vmatpush.msra.mxu0 %v414_v15  ;;  %p1383_p5 = scmp.eq.s32.totalorder %s1329_s12, 1 }
  0xa3   : > { %439 = vmatpush.msra.mxu0 %v413_v16 }
  0xa4   : > { %1339 = vmatmul.msk.f32.vlgmr.msra.gmra.mxu0 %vm417_vm2, %v1642_v17 }
  0xac   : > { %1340 = vmatmul.msk.f32.gmra.mxu0 %vm417_vm2, %v1646_v18 }
 0x121   : > { %v1650_v19 = vpop.f32.mrf.mxu0 }
 0x122   : > { %487 = vrot.lane.b32.xlu2 %v1650_v19, %s1524_s16  ;;  %518 = vrot.lane.b32.xlu1 %v1650_v19, %s1525_s17 }
 0x123   : > { %451 = vrot.lane.b32.xlu0 %v1650_v19, %s1526_s18 }
 0x129   : > { %v1668_v23 = vpop.f32.mrf.mxu0 }
 0x12a   : > { %589 = vrot.lane.b32.xlu2 %v1650_v19, %s1527_s19  ;;  %516 = vrot.lane.b32.xlu1 %v1650_v19, %s1528_s20 }
 0x132   : > { %660 = vrot.lane.b32.xlu2 %v1650_v19, %s1529_s21  ;;  %587 = vrot.lane.b32.xlu1 %v1650_v19, %s1530_s22 }
 0x13a   : > { %624 = vrot.lane.b32.xlu1 %v1650_v19, %s1531_s23  ;;  %801 = vrot.lane.b32.xlu2 %v1668_v23, %s1525_s17  ;;  %s1536_s17 = smov 24  }
 0x142   : > { %871 = vrot.lane.b32.xlu2 %v1668_v23, %s1527_s19 }
 0x17c   : > { %v488_v20 = vpop.permute.xlu2 %487 }
 0x184   : > { %v590_v24 = vpop.permute.xlu2 %589 }
 0x18c   : > { %v661_v37 = vpop.permute.xlu2 %660 }
 0x194   : > { %v519_v21 = vpop.permute.xlu1 %518  ;;  %v802_v38 = vpop.permute.xlu2 %801 }
 0x195   : > { %v452_v22 = vpop.permute.xlu0 %451  ;;  %1344 = vmatpush.xpose.msk.msra.mxu3 %vm453_vm3, %v519_v21 }
 0x196   : > { %1341 = vmatpush.xpose.msk.msra.mxu1 %vm453_vm3, %v452_v22 }
 0x199   : > { %1342 = vmatmul.msk.f32.vlgmr.msra.gmra.mxu1 %vm453_vm3, %v1650_v19 }
 0x19a   : > { %508 = vmatpush.msrb.mxu1 %v488_v20 }
 0x19c   : > { %1347 = vmatpush.xpose.msk.msra.mxu1 %vm453_vm3, %v590_v24  ;;  %v517_v25 = vpop.permute.xlu1 %516  ;;  %v872_v40 = vpop.permute.xlu2 %871 }
 0x19d   : > { %1345 = vmatmul.msk.f32.vlgmr.msra.gmra.mxu3 %vm453_vm3, %v517_v25 }
 0x1a4   : > { %v588_v26 = vpop.permute.xlu1 %587 }
 0x1ac   : > { %v625_v27 = vpop.permute.xlu1 %624 }
 0x1ad   : > { %645 = vmatpush.msrb.mxu3 %v625_v27 }
 0x216   : > { %v475_v31 = vpop.f32.mrf.mxu1 }
 0x217   : > { %v476_v32 = vadd.f32 %v475_v31, %v1679_v30 }
 0x219   : > { %v478_v33 = vsel %vm453_vm3, %v476_v32, -inf }
 0x21a   : > { %479 = vmax.xlane.f32.xlu0 %v478_v33 }
 0x220   : > { %v541_v34 = vpop.f32.mrf.mxu3 }
 0x221   : > { %v542_v35 = vadd.f32 %v541_v34, %v1679_v30 }
 0x223   : > { %v544_v36 = vsel %vm453_vm3, %v542_v35, -inf }
 0x224   : > { %545 = vmax.xlane.f32.xlu2 %v544_v36 }
 0x22e   : > { %553 = vrot.lane.b32.xlu0 %v1650_v19, %s1532_s26 }
 0x236   : > { %658 = vrot.lane.b32.xlu0 %v1650_v19, %s1533_s27 }
 0x23c   : > { %939 = vrot.lane.b32.xlu2 %v1668_v23, %s1533_s27 }
 0x23e   : > { %734 = vrot.lane.b32.xlu0 %v1668_v23, %s1526_s18  ;;  %s1537_s18 = smov 16  }
 0x246   : > { %799 = vrot.lane.b32.xlu0 %v1668_v23, %s1528_s20 }
 0x24e   : > { %869 = vrot.lane.b32.xlu0 %v1668_v23, %s1530_s22 }
 0x256   : > { %769 = vrot.lane.b32.xlu0 %v1668_v23, %s1524_s16  ;;  %s1535_s16 = smov 8  }
 0x28d   : > { %v480_v39 = vpop.xlane.xlu0 %479 }
 0x28e   : > { %v481_v41 = vsub.f32 %v476_v32, %v480_v39 }
 0x290   : > { %v482_v42 = vmul.f32 1.442695, %v481_v41 }
 0x292   : > { %1426 = vpow2.f32 %v482_v42 }
 0x297   : > { %v546_v43 = vpop.xlane.xlu2 %545 }
 0x298   : > { %v1697_v44 = vpop.eup %1426  ;;  %v547_v45 = vsub.f32 %v542_v35, %v546_v43 }
 0x299   : > { %1343 = vmatmul.msk.f32.vlgmr.msrb.gmra.mxu1 %vm453_vm3, %v1697_v44  ;;  %v484_v20 = vsel %vm453_vm3, %v1697_v44, 0.0 }
 0x29a   : > { %v548_v46 = vmul.f32 1.442695, %v547_v45 }
 0x29c   : > { %1428 = vpow2.f32 %v548_v46 }
 0x29f   : > { %v940_v9 = vpop.permute.xlu2 %939 }
 0x2a0   : > { %v554_v47 = vpop.permute.xlu0 %553 }
 0x2a1   : > { %574 = vmatpush.msra.mxu2 %v554_v47  ;;  %1348 = vmatmul.msk.f32.vlgmr.msra.gmra.mxu1 %vm453_vm3, %v588_v26 }
 0x2a2   : > { %v1429_v48 = vpop.eup %1428 }
 0x2a3   : > { %1350 = vmatpush.xpose.msk.msrb.mxu2 %vm453_vm3, %v661_v37  ;;  %v550_v11 = vsel %vm453_vm3, %v1429_v48, 0.0 }
 0x2a4   : > { %1346 = vmatmul.msk.f32.vlgmr.msra.gmra.mxu2 %vm453_vm3, %v1429_v48 }
 0x2a7   : > { %1357 = vmatpush.xpose.msk.msra.mxu2 %vm453_vm3, %v802_v38 }
 0x2a8   : > { %v659_v49 = vpop.permute.xlu0 %658 }
 0x2ac   : > { %1351 = vmatmul.msk.f32.vlgmr.msrb.gmra.mxu2 %vm453_vm3, %v659_v49 }
 0x2b0   : > { %v735_v50 = vpop.permute.xlu0 %734 }
 0x2b1   : > { %1354 = vmatpush.xpose.msk.msra.mxu3 %vm453_vm3, %v735_v50 }
 0x2b8   : > { %v800_v51 = vpop.permute.xlu0 %799 }
 0x2b9   : > { %1358 = vmatmul.msk.f32.vlgmr.msra.gmra.mxu2 %vm453_vm3, %v800_v51 }
 0x2c0   : > { %v870_v56 = vpop.permute.xlu0 %869 }
 0x2c8   : > { %v770_v58 = vpop.permute.xlu0 %769 }
 0x2c9   : > { %790 = vmatpush.msrb.mxu0 %v770_v58 }
 0x316   : > { %v1708_v52 = vpop.f32.mrf.mxu1 }
 0x31e   : > { %v612_v53 = vpop.f32.mrf.mxu1 }
 0x31f   : > { %v613_v54 = vadd.f32 %v612_v53, %v1679_v30 }
 0x321   : > { %v615_v55 = vsel %vm453_vm3, %v613_v54, -inf }
 0x322   : > { %616 = vmax.xlane.f32.xlu1 %v615_v55 }
 0x327   : > { %v1712_v57 = vpop.f32.mrf.mxu2 }
 0x32f   : > { %v683_v60 = vpop.f32.mrf.mxu2 }
 0x330   : > { %v684_v3 = vadd.f32 %v683_v60, %v1679_v30 }
 0x332   : > { %v686_v4 = vsel %vm453_vm3, %v684_v3, -inf }
 0x33b   : > { %941 = vrot.lane.b32.xlu1 %v1668_v23, %s1529_s21  ;;  %s1011_s21 = scalar_lea.vmem %s1844_s6, %s1636_s28  ;;  %s1370_s28 = sshll.u32 %s1514_s30, 6 }
 0x33c   : > { %v824_v63 = vpop.f32.mrf.mxu2  ;;  %s1797_s27 = scalar_lea.vmem %s1846_s8, %s1370_s28  ;;  %s1539_s30 = smov [#allocation3]  }
 0x33d   : > { %v825_v1 = vadd.f32 %v824_v63, %v732_v62  ;;  %s1245_s29 = sshll.u32 %s1539_s30, 4  ;;  %s1246_s29 = int_to_ptr.vmem [resolvable:$true] %s1245_s29 }
 0x33f   : > { %v827_v2 = vsel %vm453_vm3, %v825_v1, -inf }
 0x340   : > { %828 = vmax.xlane.f32.xlu2 %v827_v2 }
 0x343   : > { %695 = vrot.lane.b32.xlu1 %v1650_v19, %s1534_s15 }
 0x36d   : > { %687 = vmax.xlane.f32.xlu1 %v686_v4 }
 0x386   : > { %906 = vrot.lane.b32.xlu1 %v1668_v23, %s1531_s23 }
 0x395   : > { %v617_v5 = vpop.xlane.xlu1 %616 }
 0x396   : > { %v618_v6 = vsub.f32 %v613_v54, %v617_v5 }
 0x398   : > { %v619_v7 = vmul.f32 1.442695, %v618_v6 }
 0x39a   : > { %1430 = vpow2.f32 %v619_v7 }
 0x3a0   : > { %v1431_v8 = vpop.eup %1430 }
 0x3a1   : > { %1349 = vmatmul.msk.f32.vlgmr.msrb.gmra.mxu3 %vm453_vm3, %v1431_v8  ;;  %v621_v43 = vsel %vm453_vm3, %v1431_v8, 0.0 }
 0x3a2   : > { %1360 = vmatpush.xpose.msk.msrb.mxu3 %vm453_vm3, %v872_v40 }
 0x3a9   : > { %1355 = vmatmul.msk.f32.vlgmr.msra.gmra.mxu3 %vm453_vm3, %v1668_v23 }
 0x3ad   : > { %v942_v10 = vpop.permute.xlu1 %941 }
 0x3ae   : > { %1363 = vmatpush.xpose.msk.msrb.mxu2 %vm453_vm3, %v942_v10 }
 0x3b0   : > { %551 = vadd.xlane.f32.xlu1 %v550_v11 }
 0x3b1   : > { %1361 = vmatmul.msk.f32.vlgmr.msrb.gmra.mxu3 %vm453_vm3, %v870_v56  ;;  %1364 = vmatmul.msk.f32.vlgmr.msrb.gmra.mxu2 %vm453_vm3, %v940_v9 }
 0x3b3   : > { %v829_v12 = vpop.xlane.xlu2 %828 }
 0x3b4   : > { %v830_v13 = vsub.f32 %v825_v1, %v829_v12 }
 0x3b5   : > { %v696_v14 = vpop.permute.xlu1 %695 }
 0x3b6   : > { %v831_v15 = vmul.f32 1.442695, %v830_v13  ;;  %716 = vmatpush.msrb.mxu1 %v696_v14 }
 0x3b8   : > { %1432 = vpow2.f32 %v831_v15 }
 0x3be   : > { %v1433_v16 = vpop.eup %1432 }
 0x3bf   : > { %v833_v19 = vsel %vm453_vm3, %v1433_v16, 0.0 }
 0x3c0   : > { %834 = vadd.xlane.f32.xlu1 %v833_v19 }
 0x3c8   : > { %485 = vadd.xlane.f32.xlu1 %v484_v20 }
 0x3e0   : > { %v688_v21 = vpop.xlane.xlu1 %687 }
 0x3e1   : > { %v689_v22 = vsub.f32 %v684_v3, %v688_v21 }
 0x3e3   : > { %v690_v24 = vmul.f32 1.442695, %v689_v22 }
 0x3e5   : > { %1434 = vpow2.f32 %v690_v24 }
 0x3eb   : > { %v1435_v25 = vpop.eup %1434 }
 0x3ec   : > { %1352 = vmatmul.msk.f32.vlgmr.msrb.gmra.mxu1 %vm453_vm3, %v1435_v25  ;;  %v692_v42 = vsel %vm453_vm3, %v1435_v25, 0.0  ;;  %v1015_v25 = vld [vmem:[%s1011_s21 + $0x18] sm:$0xff] }
 0x3ed   : > { %1035 = vmatpush.msra.mxu3 %v1015_v25  ;;  %v1147_v25 = vld [vmem:[%s1797_s27 + $0x18] sm:$0xff] }
 0x3f8   : > { %v907_v26 = vpop.permute.xlu1 %906 }
 0x3f9   : > { %927 = vmatpush.msra.mxu0 %v907_v26  ;;  %v1014_v26 = vld [vmem:[%s1011_s21 + $0x10] sm:$0xff] }
 0x3fa   : > { %1036 = vmatpush.msra.mxu3 %v1014_v26 }
 0x423   : > { %v552_v28 = vpop.xlane.xlu1 %551 }
 0x424   : > { %v1738_v27 = vpop.f32.mrf.mxu3 }
 0x42c   : > { %v757_v29 = vpop.f32.mrf.mxu3 }
 0x42d   : > { %v758_v30 = vadd.f32 %v757_v29, %v732_v62 }
 0x42f   : > { %v760_v31 = vsel %vm453_vm3, %v758_v30, -inf }
 0x430   : > { %761 = vmax.xlane.f32.xlu0 %v760_v31 }
 0x433   : > { %v1741_v32 = vpop.xlane.xlu1 %834 }
 0x434   : > { %v894_v33 = vpop.f32.mrf.mxu3  ;;  %v964_v34 = vpop.f32.mrf.mxu2 }
 0x435   : > { %v895_v35 = vadd.f32 %v894_v33, %v732_v62  ;;  %v965_v36 = vadd.f32 %v964_v34, %v732_v62 }
 0x437   : > { %v967_v37 = vsel %vm453_vm3, %v965_v36, -inf  ;;  %v897_v38 = vsel %vm453_vm3, %v895_v35, -inf }
 0x438   : > { %968 = vmax.xlane.f32.xlu2 %v967_v37  ;;  %898 = vmax.xlane.f32.xlu0 %v897_v38 }
 0x43b   : > { %v486_v39 = vpop.xlane.xlu1 %485 }
 0x43c   : > { %1436 = vrcp.f32 %v486_v39 }
 0x442   : > { %v1437_v40 = vpop.eup %1436 }
 0x443   : > { %v514_v41 = vmul.f32 %v1437_v40, %v1708_v52 }
 0x445   : > { %515 = vst.msk [vmem:[#allocation2] sm:$0xff] %vm453_vm3, %v514_v41 }
 0x44c   : > { %976 = vrot.lane.b32.xlu0 %v1668_v23, %s1534_s15 }
 0x450   : > { %836 = vrot.lane.b32.xlu2 %v1668_v23, %s1532_s26 }
 0x469   : > { %v718_v3 = vpop.f32.mrf.mxu1 }
 0x476   : > { %693 = vadd.xlane.f32.xlu0 %v692_v42 }
 0x479   : > { %622 = vadd.xlane.f32.xlu2 %v621_v43 }
 0x4a3   : > { %v762_v44 = vpop.xlane.xlu0 %761 }
 0x4a4   : > { %v763_v45 = vsub.f32 %v758_v30, %v762_v44 }
 0x4a6   : > { %v764_v46 = vmul.f32 1.442695, %v763_v45  ;;  %v1538_v45 = vmov 32.0  }
 0x4a8   : > { %1438 = vpow2.f32 %v764_v46 }
 0x4ab   : > { %v969_v47 = vpop.xlane.xlu2 %968  ;;  %v899_v48 = vpop.xlane.xlu0 %898 }
 0x4ac   : > { %v970_v49 = vsub.f32 %v965_v36, %v969_v47  ;;  %v900_v50 = vsub.f32 %v895_v35, %v899_v48  ;;  %v1016_v36 = vperm.slane %v1616_v0, 0 }
 0x4ae   : > { %v1439_v51 = vpop.eup %1438  ;;  %v971_v52 = vmul.f32 1.442695, %v970_v49  ;;  %v901_v53 = vmul.f32 1.442695, %v900_v50 }
 0x4af   : > { %1356 = vmatmul.msk.f32.vlgmr.msrb.gmra.mxu0 %vm453_vm3, %v1439_v51  ;;  %v766_v60 = vsel %vm453_vm3, %v1439_v51, 0.0 }
 0x4b0   : > { %1440 = vpow2.f32 %v971_v52 }
 0x4b1   : > { %1442 = vpow2.f32 %v901_v53 }
 0x4b2   : > { %1444 = vrcp.f32 %v552_v28  ;;  %v1012_v28 = vld [vmem:[%s1011_s21] sm:$0xff] }
 0x4b3   : > { %v837_v23 = vpop.permute.xlu2 %836 }
 0x4b4   : > { %857 = vmatpush.msra.mxu1 %v837_v23 }
 0x4b5   : > { %1359 = vmatmul.msk.f32.vlgmr.msra.gmra.mxu1 %vm453_vm3, %v1433_v16 }
 0x4b6   : > { %v1441_v54 = vpop.eup %1440 }
 0x4b7   : > { %v1443_v55 = vpop.eup %1442  ;;  %v973_v56 = vsel %vm453_vm3, %v1441_v54, 0.0 }
 0x4b8   : > { %1362 = vmatmul.msk.f32.vlgmr.msra.gmra.mxu0 %vm453_vm3, %v1443_v55  ;;  %974 = vadd.xlane.f32.xlu0 %v973_v56  ;;  %v903_v58 = vsel %vm453_vm3, %v1443_v55, 0.0  ;;  %v1445_v61 = vpop.eup %1444 }
 0x4b9   : > { %904 = vadd.xlane.f32.xlu2 %v903_v58  ;;  %v580_v62 = vmul.f32 %v1445_v61, %v1712_v57  ;;  %v1108_v61 = vld [vmem:[%s1105_s24 + $0x10] sm:$0xff] }
 0x4be   : > { %v977_v59 = vpop.permute.xlu0 %976 }
 0x4bf   : > { %997 = vmatpush.msrb.mxu1 %v977_v59 }
 0x4c0   : > { %1365 = vmatmul.msk.f32.vlgmr.msrb.gmra.mxu1 %vm453_vm3, %v1441_v54 }
 0x4c1   : > { %767 = vadd.xlane.f32.xlu2 %v766_v60  ;;  %v1109_v60 = vld [vmem:[%s1105_s24 + $0x18] sm:$0xff] }
 0x4c2   : > { %1129 = vmatpush.msrb.mxu0 %v1109_v60 }
 0x4c4   : > { %1130 = vmatpush.msrb.mxu0 %v1108_v61 }
 0x4cc   : > { %582 = vrot.lane.b32.xlu0 %v580_v62, %s1535_s16  ;;  %v1107_v62 = vld [vmem:[%s1105_s24 + $0x8] sm:$0xff] }
 0x4cd   : > { %1131 = vmatpush.msrb.mxu0 %v1107_v62 }
 0x4e9   : > { %v694_v63 = vpop.xlane.xlu0 %693 }
 0x4ea   : > { %1446 = vrcp.f32 %v694_v63  ;;  %v1106_v63 = vld [vmem:[%s1105_s24] sm:$0xff] }
 0x4eb   : > { %1132 = vmatpush.msrb.mxu0 %v1106_v63 }
 0x4ec   : > { %v623_v1 = vpop.xlane.xlu2 %622 }
 0x4ed   : > { %1448 = vrcp.f32 %v623_v1 }
 0x4ee   : > { %1450 = vrcp.f32 %v1741_v32 }
 0x4f0   : > { %v1447_v2 = vpop.eup %1446 }
 0x4f1   : > { %v722_v4 = vmul.f32 %v1447_v2, %v718_v3 }
 0x4f3   : > { %v1449_v5 = vpop.eup %1448  ;;  %724 = vrot.lane.b32.xlu2 %v722_v4, %s1536_s17 }
 0x4f4   : > { %v651_v6 = vmul.f32 %v1449_v5, %v1738_v27  ;;  %v1451_v8 = vpop.eup %1450  ;;  %v1013_v27 = vld [vmem:[%s1011_s21 + $0x8] sm:$0xff] }
 0x4f5   : > { %1037 = vmatpush.msra.mxu3 %v1013_v27 }
 0x4f6   : > { %653 = vrot.lane.b32.xlu1 %v651_v6, %s1537_s18 }
 0x4f7   : > { %1038 = vmatpush.msra.mxu3 %v1012_v28 }
 0x52b   : > { %v975_v11 = vpop.xlane.xlu0 %974 }
 0x52c   : > { %v905_v57 = vpop.xlane.xlu2 %904  ;;  %v792_v7 = vpop.f32.mrf.mxu0 }
 0x52d   : > { %1452 = vrcp.f32 %v905_v57 }
 0x532   : > { %v859_v9 = vpop.f32.mrf.mxu1 }
 0x533   : > { %v863_v10 = vmul.f32 %v1451_v8, %v859_v9  ;;  %v1453_v13 = vpop.eup %1452  ;;  %v1099_v9 = vperm.slane %v1616_v0, 1 }
 0x534   : > { %v768_v12 = vpop.xlane.xlu2 %767 }
 0x535   : > { %1454 = vrcp.f32 %v768_v12  ;;  %v929_v14 = vpop.f32.mrf.mxu0  ;;  %865 = vrot.lane.b32.xlu0 %v863_v10, %s1535_s16  ;;  %v1102_v12 = vperm.slane %v1616_v0, 2 }
 0x536   : > { %v933_v15 = vmul.f32 %v1453_v13, %v929_v14  ;;  %1456 = vrcp.f32 %v975_v11 }
 0x537   : > { %1458 = vrcp.f32 %v1538_v45 }
 0x538   : > { %935 = vrot.lane.b32.xlu1 %v933_v15, %s1537_s18  ;;  %v1151_v15 = vld [vmem:[%s1797_s27 + $0x38] sm:$0xff]  ;;  %s1540_s18 = smov 128  }
 0x539   : > { %1168 = vmatpush.msra.mxu2 %v1151_v15 }
 0x53b   : > { %v1455_v16 = vpop.eup %1454 }
 0x53c   : > { %v796_v19 = vmul.f32 %v1455_v16, %v792_v7  ;;  %v1457_v20 = vpop.eup %1456  ;;  %v1150_v16 = vld [vmem:[%s1797_s27 + $0x30] sm:$0xff] }
 0x53d   : > { %v999_v21 = vpop.f32.mrf.mxu1  ;;  %v1459_v46 = vpop.eup %1458  ;;  %1169 = vmatpush.msra.mxu2 %v1150_v16 }
 0x53e   : > { %v1003_v22 = vmul.f32 %v1457_v20, %v999_v21  ;;  %v583_v24 = vpop.permute.xlu0 %582  ;;  %798 = vst.msk [vmem:[#allocation2 + $0x8] sm:$0xff] %vm453_vm3, %v796_v19  ;;  %v1055_v47 = vmul.f32 32.0, %v1459_v46  ;;  %vm1059_vm7 = vweird.f32 %v1459_v46  ;;  %v1149_v19 = vld [vmem:[%s1797_s27 + $0x28] sm:$0xff] }
 0x53f   : > { %586 = vst.msk [vmem:[#allocation2] sm:$0xff] %vm585_vm4, %v583_v24  ;;  %1170 = vmatpush.msra.mxu2 %v1149_v19 }
 0x540   : > { %1005 = vrot.lane.b32.xlu0 %v1003_v22, %s1536_s17  ;;  %v1056_v48 = vsub.f32 1.0, %v1055_v47  ;;  %v1148_v22 = vld [vmem:[%s1797_s27 + $0x20] sm:$0xff]  ;;  %s1247_s17 = sshll.u32 %s1847_s9, 4  ;;  %s1248_s17 = int_to_ptr.hbm [resolvable:$true] %s1247_s17 }
 0x541   : > { %1171 = vmatpush.msra.mxu2 %v1148_v22 }
 0x542   : > { %v1057_v49 = vmul.f32 %v1459_v46, %v1056_v48 }
 0x543   : > { %1172 = vmatpush.msra.mxu2 %v1147_v25 }
 0x544   : > { %v1058_v50 = vadd.f32 %v1459_v46, %v1057_v49 }
 0x54d   : > { %v725_v30 = vpop.permute.xlu2 %724 }
 0x568   : > { %v654_v29 = vpop.permute.xlu1 %653 }
 0x569   : > { %657 = vst.msk [vmem:[#allocation2] sm:$0xff] %vm656_vm5, %v654_v29 }
 0x56a   : > { %728 = vst.msk [vmem:[#allocation2] sm:$0xff] %vm727_vm6, %v725_v30 }
 0x571   : > { %v1009_v31 = vld [vmem:[#allocation2] sm:$0xff] }
 0x572   : > { %1366 = vmatmul.msk.f32.vlgmr.msra.gmra.mxu3 %vm417_vm2, %v1009_v31 }
 0x5a7   : > { %v866_v32 = vpop.permute.xlu0 %865 }
 0x5a8   : > { %868 = vst.msk [vmem:[#allocation2 + $0x8] sm:$0xff] %vm585_vm4, %v866_v32 }
 0x5aa   : > { %v936_v33 = vpop.permute.xlu1 %935 }
 0x5ab   : > { %938 = vst.msk [vmem:[#allocation2 + $0x8] sm:$0xff] %vm656_vm5, %v936_v33 }
 0x5b2   : > { %v1006_v34 = vpop.permute.xlu0 %1005 }
 0x5b3   : > { %1008 = vst.msk [vmem:[#allocation2 + $0x8] sm:$0xff] %vm727_vm6, %v1006_v34 }
 0x5ba   : > { %v1010_v35 = vld [vmem:[#allocation2 + $0x8] sm:$0xff] }
 0x5bb   : > { %1367 = vmatmul.msk.f32.gmra.mxu3 %vm417_vm2, %v1010_v35 }
 0x5f5   : > { %v1040_v37 = vpop.f32.mrf.mxu3 }
 0x5f6   : > { %v1041_v38 = vadd.f32 %v1040_v37, %v1016_v36  ;;  %v1145_v37 = vld [vmem:[%s1797_s27 + $0x8] sm:$0xff] }
 0x5f8   : > { %v1046_v39 = vadd.f32 %v1041_v38, %v1642_v17  ;;  %v1779_v17 = vsel %vm1059_vm7, %v1459_v46, %v1058_v50  ;;  %v1144_v38 = vld [vmem:[%s1797_s27] sm:$0xff]  ;;  %v1152_v46 = vperm.slane %v1616_v0, 5 }
 0x5fa   : > { %v1048_v40 = vsel %vm417_vm2, %v1046_v39, 0.0 }
 0x5fb   : > { %1049 = vadd.xlane.f32.xlu2 %v1048_v40 }
 0x63e   : > { %v1043_v41 = vpop.f32.mrf.mxu3 }
 0x63f   : > { %v1044_v42 = vadd.f32 %v1043_v41, %v1016_v36  ;;  %v1146_v36 = vld [vmem:[%s1797_s27 + $0x10] sm:$0xff] }
 0x640   : > { %1173 = vmatpush.msra.mxu2 %v1146_v36 }
 0x641   : > { %v1047_v43 = vadd.f32 %v1044_v42, %v1646_v18 }
 0x642   : > { %1174 = vmatpush.msra.mxu2 %v1145_v37 }
 0x643   : > { %v1051_v44 = vsel %vm417_vm2, %v1047_v43, 0.0 }
 0x644   : > { %1052 = vadd.xlane.f32.xlu1 %v1051_v44  ;;  %1175 = vmatpush.msra.mxu2 %v1144_v38 }
 0x66e   : > { %v1050_v51 = vpop.xlane.xlu2 %1049 }
 0x66f   : > { %v1061_v52 = vmul.f32 %v1779_v17, %v1050_v51 }
 0x671   : > { %v1063_v53 = vsub.f32 %v1046_v39, %v1061_v52  ;;  %v1110_v39 = vperm.slane %v1616_v0, 6 }
 0x673   : > { %v1065_v23 = vmul.f32 %v1063_v53, %v1063_v53 }
 0x675   : > { %v1067_v18 = vsel %vm417_vm2, %v1065_v23, 0.0 }
 0x676   : > { %1068 = vadd.xlane.f32.xlu0 %v1067_v18 }
 0x6b7   : > { %v1053_v54 = vpop.xlane.xlu1 %1052 }
 0x6b8   : > { %v1062_v55 = vmul.f32 %v1779_v17, %v1053_v54 }
 0x6ba   : > { %v1064_v56 = vsub.f32 %v1047_v43, %v1062_v55 }
 0x6bc   : > { %v1066_v58 = vmul.f32 %v1064_v56, %v1064_v56 }
 0x6be   : > { %v1070_v59 = vsel %vm417_vm2, %v1066_v58, 0.0 }
 0x6bf   : > { %1071 = vadd.xlane.f32.xlu2 %v1070_v59 }
 0x6e9   : > { %v1069_v1 = vpop.xlane.xlu0 %1068 }
 0x6ea   : > { %v1073_v2 = vmul.f32 %v1069_v1, %v1779_v17 }
 0x6ec   : > { %v1075_v3 = vadd.f32 1e-05, %v1073_v2 }
 0x6ee   : > { %1460 = vrsqrt.f32 %v1075_v3  ;;  %vm1083_vm9 = vweird.f32 %v1075_v3 }
 0x6f4   : > { %v1461_v4 = vpop.eup %1460 }
 0x6f5   : > { %v1078_v5 = vmul.f32 %v1461_v4, %v1075_v3  ;;  %vm1084_vm8 = vweird.f32 %v1461_v4 }
 0x6f6   : > { %vm1085_vm10 = vmor %vm1083_vm9, %vm1084_vm8 }
 0x6f7   : > { %v1079_v6 = vmul.f32 %v1461_v4, %v1078_v5 }
 0x6f9   : > { %v1080_v57 = vmul.f32 0.5, %v1079_v6 }
 0x6fb   : > { %v1081_v7 = vsub.f32 1.5, %v1080_v57 }
 0x6fd   : > { %v1082_v8 = vmul.f32 %v1461_v4, %v1081_v7 }
 0x6ff   : > { %v1086_v10 = vsel %vm1085_vm10, %v1461_v4, %v1082_v8 }
 0x700   : > { %v1097_v11 = vmul.f32 %v1086_v10, %v1063_v53 }
 0x702   : > { %v1100_v13 = vmul.f32 %v1099_v9, %v1097_v11  ;;  %v1232_v11 = vperm.slane %v1616_v0, 4 }
 0x704   : > { %v1103_v14 = vadd.f32 %v1102_v12, %v1100_v13 }
 0x706   : > { %1368 = vmatmul.msk.f32.vlgmr.msrb.gmra.mxu0 %vm417_vm2, %v1103_v14 }
 0x732   : > { %v1072_v20 = vpop.xlane.xlu2 %1071 }
 0x733   : > { %v1074_v21 = vmul.f32 %v1072_v20, %v1779_v17 }
 0x735   : > { %v1076_v24 = vadd.f32 1e-05, %v1074_v21 }
 0x737   : > { %1462 = vrsqrt.f32 %v1076_v24  ;;  %vm1093_vm12 = vweird.f32 %v1076_v24 }
 0x73d   : > { %v1463_v26 = vpop.eup %1462 }
 0x73e   : > { %v1088_v27 = vmul.f32 %v1463_v26, %v1076_v24  ;;  %vm1094_vm11 = vweird.f32 %v1463_v26 }
 0x73f   : > { %vm1095_vm13 = vmor %vm1093_vm12, %vm1094_vm11 }
 0x740   : > { %v1089_v28 = vmul.f32 %v1463_v26, %v1088_v27 }
 0x742   : > { %v1090_v29 = vmul.f32 0.5, %v1089_v28 }
 0x744   : > { %v1091_v30 = vsub.f32 1.5, %v1090_v29 }
 0x746   : > { %v1092_v31 = vmul.f32 %v1463_v26, %v1091_v30 }
 0x748   : > { %v1096_v32 = vsel %vm1095_vm13, %v1463_v26, %v1092_v31 }
 0x749   : > { %v1098_v33 = vmul.f32 %v1096_v32, %v1064_v56 }
 0x74b   : > { %v1101_v34 = vmul.f32 %v1099_v9, %v1098_v33  ;;  %v1229_v9 = vperm.slane %v1616_v0, 3 }
 0x74d   : > { %v1104_v35 = vadd.f32 %v1102_v12, %v1101_v34 }
 0x74f   : > { %1369 = vmatmul.msk.f32.gmra.mxu0 %vm417_vm2, %v1104_v35 }
 0x783   : > { %v1134_v40 = vpop.f32.mrf.mxu0 }
 0x784   : > { %v1135_v41 = vadd.f32 %v1134_v40, %v1110_v39 }
 0x786   : > { %v1140_v42 = vmax.f32 %v1135_v41, 0.0 }
 0x788   : > { %1371 = vmatmul.msk.f32.vlgmr.msra.gmra.mxu2 %vm1153_vm14, %v1140_v42 }
 0x7cc   : > { %v1137_v43 = vpop.f32.mrf.mxu0 }
 0x7cd   : > { %v1138_v44 = vadd.f32 %v1137_v43, %v1110_v39 }
 0x7cf   : > { %v1141_v45 = vmax.f32 %v1138_v44, 0.0 }
 0x7d1   : > { %1372 = vmatmul.msk.f32.gmra.mxu2 %vm1153_vm14, %v1141_v45 }
 0x80b   : > { %v1177_v47 = vpop.f32.mrf.mxu2 }
 0x80c   : > { %v1178_v48 = vadd.f32 %v1177_v47, %v1152_v46 }
 0x80e   : > { %v1183_v49 = vadd.f32 %v1178_v48, %v1103_v14 }
 0x810   : > { %v1185_v50 = vsel %vm417_vm2, %v1183_v49, 0.0 }
 0x811   : > { %1186 = vadd.xlane.f32.xlu1 %v1185_v50 }
 0x854   : > { %v1180_v51 = vpop.f32.mrf.mxu2 }
 0x855   : > { %v1181_v52 = vadd.f32 %v1180_v51, %v1152_v46 }
 0x857   : > { %v1184_v53 = vadd.f32 %v1181_v52, %v1104_v35 }
 0x859   : > { %v1188_v23 = vsel %vm417_vm2, %v1184_v53, 0.0 }
 0x85a   : > { %1189 = vadd.xlane.f32.xlu0 %v1188_v23 }
 0x884   : > { %v1187_v18 = vpop.xlane.xlu1 %1186 }
 0x885   : > { %v1191_v54 = vmul.f32 %v1187_v18, %v1779_v17 }
 0x887   : > { %v1193_v55 = vsub.f32 %v1183_v49, %v1191_v54 }
 0x889   : > { %v1195_v56 = vmul.f32 %v1193_v55, %v1193_v55 }
 0x88b   : > { %v1197_v58 = vsel %vm417_vm2, %v1195_v56, 0.0 }
 0x88c   : > { %1198 = vadd.xlane.f32.xlu2 %v1197_v58 }
 0x8cd   : > { %v1190_v59 = vpop.xlane.xlu0 %1189 }
 0x8ce   : > { %v1192_v60 = vmul.f32 %v1190_v59, %v1779_v17 }
 0x8d0   : > { %v1194_v61 = vsub.f32 %v1184_v53, %v1192_v60 }
 0x8d2   : > { %v1196_v62 = vmul.f32 %v1194_v61, %v1194_v61 }
 0x8d4   : > { %v1200_v63 = vsel %vm417_vm2, %v1196_v62, 0.0 }
 0x8d5   : > { %1201 = vadd.xlane.f32.xlu1 %v1200_v63 }
 0x8ff   : > { %v1199_v1 = vpop.xlane.xlu2 %1198 }
 0x900   : > { %v1203_v2 = vmul.f32 %v1199_v1, %v1779_v17 }
 0x902   : > { %v1205_v3 = vadd.f32 1e-05, %v1203_v2 }
 0x904   : > { %1464 = vrsqrt.f32 %v1205_v3  ;;  %vm1213_vm0 = vweird.f32 %v1205_v3 }
 0x90a   : > { %v1465_v4 = vpop.eup %1464 }
 0x90b   : > { %v1208_v5 = vmul.f32 %v1465_v4, %v1205_v3  ;;  %vm1214_vm15 = vweird.f32 %v1465_v4 }
 0x90c   : > { %vm1215_vm1 = vmor %vm1213_vm0, %vm1214_vm15 }
 0x90d   : > { %v1209_v6 = vmul.f32 %v1465_v4, %v1208_v5 }
 0x90f   : > { %v1210_v57 = vmul.f32 0.5, %v1209_v6 }
 0x911   : > { %v1211_v7 = vsub.f32 1.5, %v1210_v57 }
 0x913   : > { %v1212_v8 = vmul.f32 %v1465_v4, %v1211_v7 }
 0x915   : > { %v1216_v10 = vsel %vm1215_vm1, %v1465_v4, %v1212_v8 }
 0x916   : > { %v1227_v12 = vmul.f32 %v1216_v10, %v1193_v55 }
 0x918   : > { %v1230_v13 = vmul.f32 %v1229_v9, %v1227_v12 }
 0x91a   : > { %v1233_v14 = vadd.f32 %v1232_v11, %v1230_v13 }
 0x91c   : > { %1235 = vst.msk [vmem:[#allocation3] sm:$0xff] %vm417_vm2, %v1233_v14 }
 0x948   : > { %v1202_v15 = vpop.xlane.xlu1 %1201 }
 0x949   : > { %v1204_v16 = vmul.f32 %v1202_v15, %v1779_v17 }
 0x94b   : > { %v1206_v19 = vadd.f32 1e-05, %v1204_v16 }
 0x94d   : > { %1466 = vrsqrt.f32 %v1206_v19  ;;  %vm1223_vm4 = vweird.f32 %v1206_v19 }
 0x953   : > { %v1467_v20 = vpop.eup %1466 }
 0x954   : > { %v1218_v21 = vmul.f32 %v1467_v20, %v1206_v19  ;;  %vm1224_vm3 = vweird.f32 %v1467_v20 }
 0x955   : > { %vm1225_vm5 = vmor %vm1223_vm4, %vm1224_vm3 }
 0x956   : > { %v1219_v22 = vmul.f32 %v1467_v20, %v1218_v21 }
 0x958   : > { %v1220_v24 = vmul.f32 0.5, %v1219_v22 }
 0x95a   : > { %v1221_v25 = vsub.f32 1.5, %v1220_v24 }
 0x95c   : > { %v1222_v26 = vmul.f32 %v1467_v20, %v1221_v25 }
 0x95e   : > { %v1226_v0 = vsel %vm1225_vm5, %v1467_v20, %v1222_v26 }
 0x95f   : > { %v1228_v27 = vmul.f32 %v1226_v0, %v1194_v61 }
 0x961   : > { %v1231_v17 = vmul.f32 %v1229_v9, %v1228_v27 }
 0x963   : > { %v1234_v28 = vadd.f32 %v1232_v11, %v1231_v17 }
 0x965   : > { %1236 = vst.msk [vmem:[#allocation3 + $0x8] sm:$0xff] %vm417_vm2, %v1234_v28 }
 0x966   : > { %1380 = dma.vmem_to_hbm [thread:$0]  (%p1383_p5), %s1246_s29, 256, %s1248_s17, [#allocation4], %s1540_s18, %s1540_s18, %s1535_s16  }
 0x967   : > { %1509 = dma.done.wait (%p1383_p5), [#allocation4], 256  }
 0x968   : > { %1511 = vsyncadd (%p1383_p5), [#allocation4], 4294967040 }
 0x969 PF: > { %s20_s11 = sadd.s32 1, %s1522_s11   ;;  %s1848_s30 = smov %s1518_s10 }
 0x96a   : > { %p17_p6 = scmp.ge.s32.totalorder %s20_s11, 4   ;;  %s1849_s10 = smov %s1851_s13 }
 0x96c   :  { %19 = sbr.rel (!%p17_p6) target bundleno = 2 (0x2), region = 98 }
 0x971   :  { %1264 = vsyncpa [#allocation4], 1 }
 0x972   :  { %1266 = vsyncpa [#allocation4 + $0x1], 1 }

</bundles_post_ra>
